<compile_context>
chip_gen: v5e
topology: v5e:2x2
jax: 0.10.0
libtpu: 0.0.40
codegen_flags: <defaults>
</compile_context>

<pallas_src>
import functools

import jax
import jax.numpy as jnp
from jax import lax
from jax.experimental import pallas as pl
from jax.experimental.pallas import tpu as pltpu

NEG_SLOPE = 0.1
BN_EPS = 1e-5
_F32 = jnp.float32
_BF16 = jnp.bfloat16


def _round_up(x, m):
    return ((x + m - 1) // m) * m


# ----------------------------- Pallas kernels -----------------------------

def _matmul_stats_kernel(p_ref, wt_ref, y_ref, stats_ref):
    """Conv-as-matmul tile (bf16 x bf16 -> f32 acc).  Emits the bf16 raw conv
    output plus per-tile, per-channel sum / sum-of-squares (f32) so BatchNorm
    statistics stay global over M under tiling.  Rows 2..7 of the stats block
    are zero-filled (no uninitialized VMEM writeback)."""
    acc = jnp.dot(p_ref[...], wt_ref[...], preferred_element_type=jnp.float32)
    y_ref[...] = acc.astype(y_ref.dtype)
    s0 = jnp.sum(acc, axis=0, keepdims=True)          # (1, CP)
    s1 = jnp.sum(acc * acc, axis=0, keepdims=True)    # (1, CP)
    pad = jnp.zeros((6, acc.shape[1]), jnp.float32)
    stats_ref[...] = jnp.concatenate([s0, s1, pad], axis=0)


def _scale_bias_lrelu_kernel(y_ref, s_ref, b_ref, o_ref):
    """Streaming epilogue: y * scale + bias (BN + 1/sigma folded) + leaky_relu.
    Reads bf16, computes in f32, writes bf16 (aliased over the input buffer)."""
    y = y_ref[...].astype(jnp.float32) * s_ref[...] + b_ref[...]
    o_ref[...] = jnp.where(y >= 0, y, NEG_SLOPE * y).astype(o_ref.dtype)


def _matmul_scale_bias_lrelu_kernel(p_ref, wt_ref, s_ref, b_ref, o_ref):
    """Fully fused path (no BatchNorm): matmul -> scale/bias -> leaky_relu."""
    acc = jnp.dot(p_ref[...], wt_ref[...], preferred_element_type=jnp.float32)
    y = acc * s_ref[...] + b_ref[...]
    o_ref[...] = jnp.where(y >= 0, y, NEG_SLOPE * y).astype(o_ref.dtype)


# ------------------------------ sizing helpers -----------------------------

def _vmem_budget_and_limit():
    """(per-step VMEM budget, vmem_limit_bytes) sized per chip generation.
    v7x has 64 MiB physical VMEM per TensorCore -> stay tight; v5e/v6e have
    128 MiB -> allow bigger tiles / a higher scoped limit."""
    try:
        cap = int(getattr(pltpu.get_tpu_info(), "vmem_capacity_bytes"))
    except Exception:
        cap = 64 * 1024 * 1024  # unknown: assume the small (v7x-like) VMEM
    if cap >= 100 * 1024 * 1024:                 # v5e / v6e (128 MiB)
        return 36 * 1024 * 1024, 56 * 1024 * 1024
    return 20 * 1024 * 1024, 32 * 1024 * 1024    # v7x / unknown


def _pick_tm(M, Kp, CP, budget_bytes, y_bytes):
    """Largest M-tile whose double-buffered footprint fits the VMEM budget."""
    cap_tm = max(16, _round_up(M, 16))
    for tm in (2048, 1024, 512, 256, 128, 64, 32, 16):
        if tm > cap_tm:
            continue
        fp = (2 * tm * Kp * 2          # patches tile (bf16, double-buffered)
              + 2 * Kp * CP * 2        # weight tile (bf16, budgeted x2)
              + 2 * tm * CP * y_bytes  # output tile (double-buffered)
              + 2 * 8 * CP * 4)        # stats tile
        if fp <= budget_bytes:
            return tm
    return 16
    # TODO(synk): add a K grid axis ("arbitrary" + f32 acc scratch) once
    # TM*Kp alone can no longer fit VMEM (very large Cin*Kh*Kw convs).


def _pick_epilogue_rows(TM, num_tiles, CP, budget_bytes):
    """Decouple the streaming-epilogue tile from the matmul TM: biggest
    lane-dense block (multiple of TM dividing Mp) that still fits VMEM."""
    for g in range(num_tiles, 0, -1):
        if num_tiles % g:
            continue
        tm2 = TM * g
        fp = 2 * tm2 * CP * 2 * 2      # bf16 in + bf16 out, double-buffered
        if tm2 <= 8192 and fp <= budget_bytes:
            return tm2
    return TM


# --------------------------------- wrapper ---------------------------------

def conv2d_wsn_forward(x, weight, u, gamma, beta, *, stride=1, padding=0,
                       bn_flag=False):
    """Forward pass of Conv2d_wSN.

    x:      (N, Cin, H, W)      NCHW
    weight: (Cout, Cin, Kh, Kw) raw conv weight (spectral norm applied here)
    u:      (Cout,)             spectral-norm power-iteration vector
    gamma, beta: (Cout,)        BN affine parameters (used iff bn_flag)

    Returns (y_nchw_f32, u_updated).  PyTorch's spectral_norm updates `u` in
    place; the updated vector is returned so callers can persist it.
    Conv bias is intentionally absent (module constructs Conv2d with bias=False).
    """
    x = x.astype(_F32)
    weight = weight.astype(_F32)
    gamma = gamma.astype(_F32)
    beta = beta.astype(_F32)

    N, C, H, W = x.shape
    Cout, Cin, Kh, Kw = weight.shape
    assert C == Cin

    # ---- spectral norm: one power iteration (PyTorch training-mode default) ----
    w_mat = weight.reshape(Cout, Cin * Kh * Kw)
    w_ng = lax.stop_gradient(w_mat)
    u0 = lax.stop_gradient(u.astype(_F32))
    v = w_ng.T @ u0
    v = v / jnp.maximum(jnp.linalg.norm(v), 1e-12)
    u_new = w_ng @ v
    u_new = u_new / jnp.maximum(jnp.linalg.norm(u_new), 1e-12)
    sigma = jnp.dot(lax.stop_gradient(u_new), w_mat @ lax.stop_gradient(v))
    inv_sigma = 1.0 / sigma        # folded into the epilogue scale

    # ---- im2col in bf16, NHWC-contiguous K order (Kh, Kw, Cin) ----
    s, p = stride, padding
    H_out = (H + 2 * p - Kh) // s + 1
    W_out = (W + 2 * p - Kw) // s + 1
    x_nhwc = jnp.transpose(x, (0, 2, 3, 1)).astype(_BF16)   # cast BEFORE im2col
    xp = jnp.pad(x_nhwc, ((0, 0), (p, p), (p, p), (0, 0)))
    cols = []
    for i in range(Kh):
        for j in range(Kw):
            cols.append(xp[:, i:i + s * H_out:s, j:j + s * W_out:s, :])
    M = N * H_out * W_out
    K = Kh * Kw * Cin
    patches = jnp.concatenate(cols, axis=-1).reshape(M, K)   # bf16
    # TODO(synk): fuse im2col into the kernel (Element-offset index_maps or a
    # manual per-(kh,kw) DMA loop over the padded NHWC input) to remove the
    # Kh*Kw-fold HBM read amplification of materializing `patches`.

    # weight in matching K order: (Cout,Cin,Kh,Kw) -> (Kh,Kw,Cin,Cout) -> (K,Cout)
    wt = jnp.transpose(weight, (2, 3, 1, 0)).reshape(K, Cout)

    # ---- TPU-friendly padding: lane-dense output (CP mult of 128), K -> 128 ----
    CP = _round_up(Cout, 128)
    Kp = _round_up(K, 128)

    budget, vmem_limit = _vmem_budget_and_limit()
    TM = _pick_tm(M, Kp, CP, budget, y_bytes=2)
    num_tiles = -(-M // TM)
    Mp = num_tiles * TM

    # zero-padded extra M rows keep the (global) BN sums exact: they add 0.
    patches_p = jnp.pad(patches, ((0, Mp - M), (0, Kp - K)))
    wt_p = jnp.pad(wt, ((0, Kp - K), (0, CP - Cout))).astype(_BF16)

    cparams = pltpu.CompilerParams(
        dimension_semantics=("parallel",),      # 2 TCs on v7x split the M tiles
        vmem_limit_bytes=vmem_limit,
    )

    p_spec = pl.BlockSpec((TM, Kp), lambda i: (i, 0))
    w_spec = pl.BlockSpec((Kp, CP), lambda i: (0, 0))        # grid-invariant
    vec_spec = pl.BlockSpec((1, CP), lambda i: (0, 0))
    y_spec = pl.BlockSpec((TM, CP), lambda i: (i, 0))
    stats_spec = pl.BlockSpec((None, 8, CP), lambda i: (i, 0, 0))

    if bn_flag:
        # Pass 1: bf16 raw conv output + per-tile f32 channel sums / sq-sums.
        y_raw, stats = pl.pallas_call(
            _matmul_stats_kernel,
            out_shape=(jax.ShapeDtypeStruct((Mp, CP), _BF16),
                       jax.ShapeDtypeStruct((num_tiles, 8, CP), _F32)),
            grid=(num_tiles,),
            in_specs=[p_spec, w_spec],
            out_specs=(y_spec, stats_spec),
            compiler_params=cparams,
        )(patches_p, wt_p)

        # Tiny reduction over tiles -> global train-mode BN stats over all M rows.
        col_sum = jnp.sum(stats[:, 0, :Cout], axis=0)
        col_sq = jnp.sum(stats[:, 1, :Cout], axis=0)
        mean = col_sum * (inv_sigma / M)
        var = col_sq * (inv_sigma * inv_sigma / M) - mean * mean
        var = jnp.maximum(var, 0.0)            # guard E[x^2]-E[x]^2 cancellation
        bn_scale = gamma * lax.rsqrt(var + BN_EPS)
        scale = bn_scale * inv_sigma           # applied to the raw (pre-sigma) y
        bias = beta - mean * bn_scale

        scale_p = jnp.pad(scale, (0, CP - Cout)).reshape(1, CP)
        bias_p = jnp.pad(bias, (0, CP - Cout)).reshape(1, CP)

        # Pass 2: large-tile streaming FMA + leaky_relu; output aliases y_raw.
        TM2 = _pick_epilogue_rows(TM, num_tiles, CP, budget)
        y2_spec = pl.BlockSpec((TM2, CP), lambda i: (i, 0))
        out = pl.pallas_call(
            _scale_bias_lrelu_kernel,
            out_shape=jax.ShapeDtypeStruct((Mp, CP), _BF16),
            grid=(Mp // TM2,),
            in_specs=[y2_spec, vec_spec, vec_spec],
            out_specs=y2_spec,
            input_output_aliases={0: 0},       # reuse y_raw's HBM buffer
            compiler_params=cparams,
        )(y_raw, scale_p, bias_p)
    else:
        # No BN: fully fused single pass; 1/sigma folded into the scale.
        scale_p = jnp.full((1, CP), inv_sigma, dtype=_F32)
        bias_p = jnp.zeros((1, CP), dtype=_F32)
        out = pl.pallas_call(
            _matmul_scale_bias_lrelu_kernel,
            out_shape=jax.ShapeDtypeStruct((Mp, CP), _BF16),
            grid=(num_tiles,),
            in_specs=[p_spec, w_spec, vec_spec, vec_spec],
            out_specs=y_spec,
            compiler_params=cparams,
        )(patches_p, wt_p, scale_p, bias_p)

    # Strip padding; NCHW + f32 for module fidelity (the consumer could keep
    # NHWC/bf16 and skip this copy if it tolerates that layout/dtype).
    out = out[:M, :Cout].reshape(N, H_out, W_out, Cout)
    out = jnp.transpose(out, (0, 3, 1, 2)).astype(_F32)
    return out, u_new


# -------------------------------- reference --------------------------------

def _reference(x, weight, u, gamma, beta, *, stride, padding, bn_flag):
    w_mat = weight.reshape(weight.shape[0], -1)
    v = w_mat.T @ u
    v = v / jnp.maximum(jnp.linalg.norm(v), 1e-12)
    u_new = w_mat @ v
    u_new = u_new / jnp.maximum(jnp.linalg.norm(u_new), 1e-12)
    sigma = u_new @ (w_mat @ v)
    w_sn = weight / sigma
    y = lax.conv_general_dilated(
        x, w_sn, (stride, stride), [(padding, padding), (padding, padding)],
        dimension_numbers=("NCHW", "OIHW", "NCHW"))
    if bn_flag:
        mean = jnp.mean(y, axis=(0, 2, 3), keepdims=True)
        var = jnp.mean((y - mean) ** 2, axis=(0, 2, 3), keepdims=True)
        y = (y - mean) * lax.rsqrt(var + BN_EPS)
        y = y * gamma.reshape(1, -1, 1, 1) + beta.reshape(1, -1, 1, 1)
    return jnp.where(y >= 0, y, NEG_SLOPE * y)


if __name__ == "__main__":
    key = jax.random.PRNGKey(0)
    k_x, k_w, k_u = jax.random.split(key, 3)

    # Small shapes consistent with an InfoGAN-MNIST discriminator conv block.
    N, Cin, H, W = 2, 4, 16, 16
    Cout, Ksz = 8, 3
    stride, padding = 1, 1

    x = jax.random.normal(k_x, (N, Cin, H, W), dtype=jnp.float32)
    fan_in = Cin * Ksz * Ksz
    weight = jax.random.normal(k_w, (Cout, Cin, Ksz, Ksz), dtype=jnp.float32) / jnp.sqrt(fan_in)
    u0 = jax.random.normal(k_u, (Cout,), dtype=jnp.float32)
    u0 = u0 / jnp.maximum(jnp.linalg.norm(u0), 1e-12)
    gamma = jnp.ones((Cout,), dtype=jnp.float32)
    beta = jnp.zeros((Cout,), dtype=jnp.float32)

    # bn_flag=True path (conv -> BN -> leaky_relu)
    fwd_bn = jax.jit(functools.partial(conv2d_wsn_forward,
                                       stride=stride, padding=padding, bn_flag=True))
    y, u_next = fwd_bn(x, weight, u0, gamma, beta)
    jax.block_until_ready(y)
    assert y.shape == (N, Cout, H, W), y.shape
    assert bool(jnp.all(jnp.isfinite(y)))
    y_ref = _reference(x, weight, u0, gamma, beta,
                       stride=stride, padding=padding, bn_flag=True)
    assert float(jnp.max(jnp.abs(y - y_ref))) < 1e-1  # bf16 matmul/store tolerance

    # bn_flag=False path (conv -> leaky_relu)
    fwd = jax.jit(functools.partial(conv2d_wsn_forward,
                                    stride=stride, padding=padding, bn_flag=False))
    y2, _ = fwd(x, weight, u0, gamma, beta)
    jax.block_until_ready(y2)
    assert y2.shape == (N, Cout, H, W), y2.shape
    y2_ref = _reference(x, weight, u0, gamma, beta,
                        stride=stride, padding=padding, bn_flag=False)
    assert float(jnp.max(jnp.abs(y2 - y2_ref))) < 1e-1

    print("KERNEL_OK")
</pallas_src>

<mosaic_0001>
module attributes {stable_mosaic.version = 11 : i64} {
  func.func @_matmul_stats_kernel(%arg0: i32, %arg1: memref<512x128xbf16, #tpu.memory_space<vmem>>, %arg2: memref<128x128xbf16, #tpu.memory_space<vmem>>, %arg3: memref<512x128xbf16, #tpu.memory_space<vmem>>, %arg4: memref<1x8x128xf32, #tpu.memory_space<vmem>>) attributes {dimension_semantics = [#tpu.dimension_semantics<parallel>], iteration_bounds = array<i64: 1>, scalar_prefetch = 0 : i64, scratch_operands = 0 : i64, tpu.core_type = #tpu.core_type<tc>, window_params = [{transform_indices = @transform_0, window_bounds = array<i64: 512, 128>}, {pipeline_mode = #tpu.pipeline_mode<synchronous>, transform_indices = @transform_1, window_bounds = array<i64: 128, 128>}, {transform_indices = @transform_2, window_bounds = array<i64: 512, 128>}, {transform_indices = @transform_3, window_bounds = array<i64: 1, 8, 128>}]} {
    %c0 = arith.constant 0 : index
    %c0_0 = arith.constant 0 : index
    %0 = vector.load %arg1[%c0, %c0_0] : memref<512x128xbf16, #tpu.memory_space<vmem>>, vector<512x128xbf16>
    %c0_1 = arith.constant 0 : index
    %c0_2 = arith.constant 0 : index
    %1 = vector.load %arg2[%c0_1, %c0_2] : memref<128x128xbf16, #tpu.memory_space<vmem>>, vector<128x128xbf16>
    %cst = arith.constant dense<0.000000e+00> : vector<512x128xf32>
    %2 = tpu.matmul %0, %1, %cst {dimension_numbers = #tpu.dot_dimension_numbers<[1], [0], [0], [1], [0, 0, 1, 1], [], []>} : vector<512x128xbf16>, vector<128x128xbf16>, vector<512x128xf32> -> vector<512x128xf32>
    %3 = arith.truncf %2 : vector<512x128xf32> to vector<512x128xbf16>
    %c0_3 = arith.constant 0 : index
    %c0_4 = arith.constant 0 : index
    %4 = vector.load %arg3[%c0_3, %c0_4] : memref<512x128xbf16, #tpu.memory_space<vmem>>, vector<512x128xbf16>
    tpu.vector_store %arg3[%c0_3, %c0_4], %3 {strides = array<i32>} : memref<512x128xbf16, #tpu.memory_space<vmem>>, vector<512x128xbf16>,
    %cst_5 = arith.constant dense<0.000000e+00> : vector<128xf32>
    %5 = vector.multi_reduction <add>, %2, %cst_5 [0] : vector<512x128xf32> to vector<128xf32>
    %6 = vector.shape_cast %5 : vector<128xf32> to vector<1x128xf32>
    %7 = arith.mulf %2, %2 : vector<512x128xf32>
    %cst_6 = arith.constant dense<0.000000e+00> : vector<128xf32>
    %8 = vector.multi_reduction <add>, %7, %cst_6 [0] : vector<512x128xf32> to vector<128xf32>
    %9 = vector.shape_cast %8 : vector<128xf32> to vector<1x128xf32>
    %cst_7 = arith.constant 0.000000e+00 : f32
    %10 = vector.broadcast %cst_7 : f32 to vector<6x128xf32>
    %11 = tpu.concatenate %6, %9, %10 in 0 : vector<1x128xf32>, vector<1x128xf32>, vector<6x128xf32> -> vector<8x128xf32>
    %c0_8 = arith.constant 0 : index
    %c0_9 = arith.constant 0 : index
    %c0_10 = arith.constant 0 : index
    %12 = vector.load %arg4[%c0_8, %c0_9, %c0_10] : memref<1x8x128xf32, #tpu.memory_space<vmem>>, vector<1x8x128xf32>
    %13 = vector.shape_cast %12 : vector<1x8x128xf32> to vector<8x128xf32>
    %14 = vector.shape_cast %11 : vector<8x128xf32> to vector<1x8x128xf32>
    tpu.vector_store %arg4[%c0_8, %c0_9, %c0_10], %14 {strides = array<i32>} : memref<1x8x128xf32, #tpu.memory_space<vmem>>, vector<1x8x128xf32>,
    return
  }
  func.func @transform_0(%arg0: i32) -> (i32, i32) {
    %c0_i32 = arith.constant 0 : i32
    %c0_i32_0 = arith.constant 0 : i32
    return %arg0, %c0_i32 : i32, i32
  }
  func.func @transform_1(%arg0: i32) -> (i32, i32) {
    %c0_i32 = arith.constant 0 : i32
    %c0_i32_0 = arith.constant 0 : i32
    %c0_i32_1 = arith.constant 0 : i32
    return %c0_i32, %c0_i32_0 : i32, i32
  }
  func.func @transform_2(%arg0: i32) -> (i32, i32) {
    %c0_i32 = arith.constant 0 : i32
    %c0_i32_0 = arith.constant 0 : i32
    return %arg0, %c0_i32 : i32, i32
  }
  func.func @transform_3(%arg0: i32) -> (i32, i32, i32) {
    %c0_i32 = arith.constant 0 : i32
    %c0_i32_0 = arith.constant 0 : i32
    %c0_i32_1 = arith.constant 0 : i32
    return %arg0, %c0_i32, %c0_i32_0 : i32, i32, i32
  }
}

module attributes {stable_mosaic.version = 11 : i64} {
  func.func @_scale_bias_lrelu_kernel(%arg0: i32, %arg1: memref<512x128xbf16, #tpu.memory_space<vmem>>, %arg2: memref<1x128xf32, #tpu.memory_space<vmem>>, %arg3: memref<1x128xf32, #tpu.memory_space<vmem>>, %arg4: memref<512x128xbf16, #tpu.memory_space<vmem>>) attributes {dimension_semantics = [#tpu.dimension_semantics<parallel>], iteration_bounds = array<i64: 1>, scalar_prefetch = 0 : i64, scratch_operands = 0 : i64, tpu.core_type = #tpu.core_type<tc>, window_params = [{transform_indices = @transform_0, window_bounds = array<i64: 512, 128>}, {pipeline_mode = #tpu.pipeline_mode<synchronous>, transform_indices = @transform_1, window_bounds = array<i64: 1, 128>}, {pipeline_mode = #tpu.pipeline_mode<synchronous>, transform_indices = @transform_2, window_bounds = array<i64: 1, 128>}, {transform_indices = @transform_3, window_bounds = array<i64: 512, 128>}]} {
    %c0 = arith.constant 0 : index
    %c0_0 = arith.constant 0 : index
    %0 = vector.load %arg1[%c0, %c0_0] : memref<512x128xbf16, #tpu.memory_space<vmem>>, vector<512x128xbf16>
    %1 = arith.extf %0 : vector<512x128xbf16> to vector<512x128xf32>
    %c0_1 = arith.constant 0 : index
    %c0_2 = arith.constant 0 : index
    %2 = vector.load %arg2[%c0_1, %c0_2] : memref<1x128xf32, #tpu.memory_space<vmem>>, vector<1x128xf32>
    %3 = vector.broadcast %2 : vector<1x128xf32> to vector<512x128xf32>
    %4 = arith.mulf %1, %3 : vector<512x128xf32>
    %c0_3 = arith.constant 0 : index
    %c0_4 = arith.constant 0 : index
    %5 = vector.load %arg3[%c0_3, %c0_4] : memref<1x128xf32, #tpu.memory_space<vmem>>, vector<1x128xf32>
    %6 = vector.broadcast %5 : vector<1x128xf32> to vector<512x128xf32>
    %7 = arith.addf %4, %6 : vector<512x128xf32>
    %cst = arith.constant 0.000000e+00 : f32
    %8 = vector.broadcast %cst : f32 to vector<512x128xf32>
    %9 = arith.cmpf oge, %7, %8 : vector<512x128xf32>
    %cst_5 = arith.constant 1.000000e-01 : f32
    %10 = vector.broadcast %cst_5 : f32 to vector<512x128xf32>
    %11 = arith.mulf %10, %7 : vector<512x128xf32>
    %12 = arith.select %9, %7, %11 : vector<512x128xi1>, vector<512x128xf32>
    %13 = arith.truncf %12 : vector<512x128xf32> to vector<512x128xbf16>
    %c0_6 = arith.constant 0 : index
    %c0_7 = arith.constant 0 : index
    %14 = vector.load %arg4[%c0_6, %c0_7] : memref<512x128xbf16, #tpu.memory_space<vmem>>, vector<512x128xbf16>
    tpu.vector_store %arg4[%c0_6, %c0_7], %13 {strides = array<i32>} : memref<512x128xbf16, #tpu.memory_space<vmem>>, vector<512x128xbf16>,
    return
  }
  func.func @transform_0(%arg0: i32) -> (i32, i32) {
    %c0_i32 = arith.constant 0 : i32
    %c0_i32_0 = arith.constant 0 : i32
    return %arg0, %c0_i32 : i32, i32
  }
  func.func @transform_1(%arg0: i32) -> (i32, i32) {
    %c0_i32 = arith.constant 0 : i32
    %c0_i32_0 = arith.constant 0 : i32
    %c0_i32_1 = arith.constant 0 : i32
    return %c0_i32, %c0_i32_0 : i32, i32
  }
  func.func @transform_2(%arg0: i32) -> (i32, i32) {
    %c0_i32 = arith.constant 0 : i32
    %c0_i32_0 = arith.constant 0 : i32
    %c0_i32_1 = arith.constant 0 : i32
    return %c0_i32, %c0_i32_0 : i32, i32
  }
  func.func @transform_3(%arg0: i32) -> (i32, i32) {
    %c0_i32 = arith.constant 0 : i32
    %c0_i32_0 = arith.constant 0 : i32
    return %arg0, %c0_i32 : i32, i32
  }
}

</mosaic_0001>

<bundles_post_ra>
// kernel: conv2d_wsn_forward.3
= control target key start
LH: loop header
LB: loop body
LE: loop exit
PB: predicated region body
PF: predicated region fallthrough
CT: control target
= control target key end

     0   :  { %s1304_s0 = inlined_call_operand.vmem [shape: bf16[512,128], index: 0, kind: input, shape index: {}, may-alias: {0,3}]   ;;  %s1305_s1 = inlined_call_operand.vmem [shape: f32[1,128], index: 1, kind: input, shape index: {}]   ;;  %s1306_s2 = inlined_call_operand.vmem [shape: f32[1,128], index: 2, kind: input, shape index: {}]   ;;  %s1307_s3 = inlined_call_operand.vmem [shape: bf16[512,128], index: 3, kind: output, shape index: {}, may-alias: {0,3}]  }
   0x1   :  { %v603_v0 = vld [vmem:[%s1304_s0] sm:$0xff]   ;;  %v890_v5 = vld [vmem:[%s1304_s0 + $0x8] sm:$0xff]   ;;  %v891_v8 = vld [vmem:[%s1304_s0 + $0x10] sm:$0xff]  }
   0x2   :  { %v980_v1 = vld [vmem:[%s1305_s1] ss:$0 sm:$0xff]  ;;  %v604_v2 = vunpack.c.l.bf16 %v603_v0  ;;  %v605_v3 = vunpack.c.h.bf16 %v603_v0  ;;  %v608_v6 = vunpack.c.l.bf16 %v890_v5  ;;  %v609_v7 = vunpack.c.h.bf16 %v890_v5  ;;  %v892_v9 = vld [vmem:[%s1304_s0 + $0x18] sm:$0xff]   ;;  %v894_v39 = vld [vmem:[%s1304_s0 + $0x28] sm:$0xff]  }
   0x3   :  { %v985_v4 = vld [vmem:[%s1306_s2] ss:$0 sm:$0xff]  ;;  %v612_v12 = vunpack.c.l.bf16 %v891_v8  ;;  %v613_v13 = vunpack.c.h.bf16 %v891_v8  ;;  %v616_v16 = vunpack.c.l.bf16 %v892_v9  ;;  %v617_v17 = vunpack.c.h.bf16 %v892_v9 }
   0x4   :  { %v146_v10 = vmul.f32 %v980_v1, %v604_v2  ;;  %v147_v11 = vmul.f32 %v980_v1, %v605_v3  ;;  %v148_v14 = vmul.f32 %v980_v1, %v608_v6  ;;  %v149_v15 = vmul.f32 %v980_v1, %v609_v7  ;;  %v893_v38 = vld [vmem:[%s1304_s0 + $0x20] sm:$0xff]  }
   0x5   :  { %v150_v20 = vmul.f32 %v980_v1, %v612_v12  ;;  %v151_v21 = vmul.f32 %v980_v1, %v613_v13  ;;  %v152_v24 = vmul.f32 %v980_v1, %v616_v16  ;;  %v153_v25 = vmul.f32 %v980_v1, %v617_v17 }
   0x6   :  { %v214_v18 = vadd.f32 %v985_v4, %v146_v10  ;;  %v215_v19 = vadd.f32 %v985_v4, %v147_v11  ;;  %v216_v22 = vadd.f32 %v985_v4, %v148_v14  ;;  %v217_v23 = vadd.f32 %v985_v4, %v149_v15 }
   0x7   :  { %v218_v32 = vadd.f32 %v985_v4, %v150_v20  ;;  %v219_v33 = vadd.f32 %v985_v4, %v151_v21  ;;  %v220_v37 = vadd.f32 %v985_v4, %v152_v24  ;;  %v221_v43 = vadd.f32 %v985_v4, %v153_v25 }
   0x8   :  { %vm278_vm0 = vcmp.ge.f32.partialorder %v214_v18, 0.0  ;;  %vm279_vm1 = vcmp.ge.f32.partialorder %v215_v19, 0.0  ;;  %v342_v26 = vmul.f32 0.1, %v214_v18  ;;  %v343_v27 = vmul.f32 0.1, %v215_v19 }
   0x9   :  { %vm280_vm2 = vcmp.ge.f32.partialorder %v216_v22, 0.0  ;;  %vm281_vm3 = vcmp.ge.f32.partialorder %v217_v23, 0.0  ;;  %v344_v28 = vmul.f32 0.1, %v216_v22  ;;  %v345_v29 = vmul.f32 0.1, %v217_v23 }
   0xa   :  { %v406_v30 = vsel %vm278_vm0, %v214_v18, %v342_v26  ;;  %v407_v31 = vsel %vm279_vm1, %v215_v19, %v343_v27  ;;  %vm282_vm4 = vcmp.ge.f32.partialorder %v218_v32, 0.0  ;;  %vm283_vm5 = vcmp.ge.f32.partialorder %v219_v33, 0.0 }
   0xb   :  { %v733_v34 = vpack.c.bf16 %v407_v31, %v406_v30  ;;  %v408_v35 = vsel %vm280_vm2, %v216_v22, %v344_v28  ;;  %v409_v36 = vsel %vm281_vm3, %v217_v23, %v345_v29  ;;  %v346_v41 = vmul.f32 0.1, %v218_v32 }
   0xc   :  { %v738_v40 = vpack.c.bf16 %v409_v36, %v408_v35  ;;  %v347_v42 = vmul.f32 0.1, %v219_v33  ;;  %vm284_vm6 = vcmp.ge.f32.partialorder %v220_v37, 0.0  ;;  %v348_v44 = vmul.f32 0.1, %v220_v37 }
   0xd   :  { %734 = vst [vmem:[%s1307_s3] sm:$0xff] %v733_v34   ;;  %v410_v45 = vsel %vm282_vm4, %v218_v32, %v346_v41  ;;  %v620_v46 = vunpack.c.l.bf16 %v893_v38  ;;  %v621_v47 = vunpack.c.h.bf16 %v893_v38  ;;  %v624_v48 = vunpack.c.l.bf16 %v894_v39 }
   0xe   :  { %921 = vst [vmem:[%s1307_s3 + $0x8] sm:$0xff] %v738_v40   ;;  %v411_v50 = vsel %vm283_vm5, %v219_v33, %v347_v42  ;;  %vm285_vm7 = vcmp.ge.f32.partialorder %v221_v43, 0.0  ;;  %v349_v51 = vmul.f32 0.1, %v221_v43  ;;  %v412_v52 = vsel %vm284_vm6, %v220_v37, %v348_v44 }
   0xf   :  { %v743_v53 = vpack.c.bf16 %v411_v50, %v410_v45  ;;  %v154_v54 = vmul.f32 %v980_v1, %v620_v46  ;;  %v155_v55 = vmul.f32 %v980_v1, %v621_v47  ;;  %v625_v56 = vunpack.c.h.bf16 %v894_v39 }
  0x10   :  { %v413_v58 = vsel %vm285_vm7, %v221_v43, %v349_v51  ;;  %v156_v59 = vmul.f32 %v980_v1, %v624_v48 }
  0x11   :  { %v748_v62 = vpack.c.bf16 %v413_v58, %v412_v52  ;;  %v222_v63 = vadd.f32 %v985_v4, %v154_v54  ;;  %v223_v0 = vadd.f32 %v985_v4, %v155_v55  ;;  %v157_v2 = vmul.f32 %v980_v1, %v625_v56 }
  0x12   :  { %v224_v3 = vadd.f32 %v985_v4, %v156_v59 }
  0x13   :  { %vm286_vm8 = vcmp.ge.f32.partialorder %v222_v63, 0.0  ;;  %vm287_vm9 = vcmp.ge.f32.partialorder %v223_v0, 0.0  ;;  %v350_v8 = vmul.f32 0.1, %v222_v63  ;;  %v225_v9 = vadd.f32 %v985_v4, %v157_v2 }
  0x14   :  { %v351_v10 = vmul.f32 0.1, %v223_v0  ;;  %vm288_vm10 = vcmp.ge.f32.partialorder %v224_v3, 0.0  ;;  %v352_v11 = vmul.f32 0.1, %v224_v3 }
  0x15   :  { %v895_v49 = vld [vmem:[%s1304_s0 + $0x30] sm:$0xff]   ;;  %v896_v57 = vld [vmem:[%s1304_s0 + $0x38] sm:$0xff]   ;;  %v414_v13 = vsel %vm286_vm8, %v222_v63, %v350_v8  ;;  %vm289_vm11 = vcmp.ge.f32.partialorder %v225_v9, 0.0  ;;  %v353_v14 = vmul.f32 0.1, %v225_v9 }
  0x16   :  { %v628_v60 = vunpack.c.l.bf16 %v895_v49  ;;  %v629_v61 = vunpack.c.h.bf16 %v895_v49  ;;  %922 = vst [vmem:[%s1307_s3 + $0x10] sm:$0xff] %v743_v53   ;;  %v632_v7 = vunpack.c.l.bf16 %v896_v57  ;;  %v415_v16 = vsel %vm287_vm9, %v223_v0, %v351_v10 }
  0x17   :  { %923 = vst [vmem:[%s1307_s3 + $0x18] sm:$0xff] %v748_v62   ;;  %v416_v17 = vsel %vm288_vm10, %v224_v3, %v352_v11  ;;  %v753_v21 = vpack.c.bf16 %v415_v16, %v414_v13  ;;  %v417_v22 = vsel %vm289_vm11, %v225_v9, %v353_v14  ;;  %v633_v26 = vunpack.c.h.bf16 %v896_v57 }
  0x18   :  { %v158_v5 = vmul.f32 %v980_v1, %v628_v60  ;;  %v159_v6 = vmul.f32 %v980_v1, %v629_v61  ;;  %v758_v24 = vpack.c.bf16 %v417_v22, %v416_v17  ;;  %v160_v27 = vmul.f32 %v980_v1, %v632_v7 }
  0x19   :  { %v161_v34 = vmul.f32 %v980_v1, %v633_v26 }
  0x1a   :  { %v226_v12 = vadd.f32 %v985_v4, %v158_v5  ;;  %v227_v15 = vadd.f32 %v985_v4, %v159_v6  ;;  %v228_v35 = vadd.f32 %v985_v4, %v160_v27 }
  0x1b   :  { %v229_v41 = vadd.f32 %v985_v4, %v161_v34 }
  0x1c   :  { %vm290_vm12 = vcmp.ge.f32.partialorder %v226_v12, 0.0  ;;  %v354_v18 = vmul.f32 0.1, %v226_v12  ;;  %vm291_vm13 = vcmp.ge.f32.partialorder %v227_v15, 0.0  ;;  %v355_v23 = vmul.f32 0.1, %v227_v15 }
  0x1d   :  { %vm292_vm14 = vcmp.ge.f32.partialorder %v228_v35, 0.0  ;;  %v356_v42 = vmul.f32 0.1, %v228_v35  ;;  %vm293_vm15 = vcmp.ge.f32.partialorder %v229_v41, 0.0  ;;  %v357_v48 = vmul.f32 0.1, %v229_v41 }
  0x1e   :  { %v897_v19 = vld [vmem:[%s1304_s0 + $0x40] sm:$0xff]   ;;  %v898_v20 = vld [vmem:[%s1304_s0 + $0x48] sm:$0xff]   ;;  %v418_v25 = vsel %vm290_vm12, %v226_v12, %v354_v18  ;;  %v899_v28 = vld [vmem:[%s1304_s0 + $0x50] sm:$0xff]   ;;  %v419_v29 = vsel %vm291_vm13, %v227_v15, %v355_v23 }
  0x1f   :  { %924 = vst [vmem:[%s1307_s3 + $0x20] sm:$0xff] %v753_v21   ;;  %v636_v30 = vunpack.c.l.bf16 %v897_v19  ;;  %v637_v31 = vunpack.c.h.bf16 %v897_v19  ;;  %v640_v32 = vunpack.c.l.bf16 %v898_v20  ;;  %v763_v33 = vpack.c.bf16 %v419_v29, %v418_v25 }
  0x20   :  { %925 = vst [vmem:[%s1307_s3 + $0x28] sm:$0xff] %v758_v24   ;;  %v641_v36 = vunpack.c.h.bf16 %v898_v20  ;;  %v644_v40 = vunpack.c.l.bf16 %v899_v28  ;;  %v645_v47 = vunpack.c.h.bf16 %v899_v28  ;;  %v420_v49 = vsel %vm292_vm14, %v228_v35, %v356_v42 }
  0x21   :  { %v162_v37 = vmul.f32 %v980_v1, %v636_v30  ;;  %v163_v38 = vmul.f32 %v980_v1, %v637_v31  ;;  %v164_v39 = vmul.f32 %v980_v1, %v640_v32  ;;  %926 = vst [vmem:[%s1307_s3 + $0x30] sm:$0xff] %v763_v33   ;;  %v421_v53 = vsel %vm293_vm15, %v229_v41, %v357_v48 }
  0x22   :  { %v165_v43 = vmul.f32 %v980_v1, %v641_v36  ;;  %v768_v57 = vpack.c.bf16 %v421_v53, %v420_v49  ;;  %v166_v63 = vmul.f32 %v980_v1, %v644_v40  ;;  %v167_v0 = vmul.f32 %v980_v1, %v645_v47 }
  0x23   :  { %v230_v44 = vadd.f32 %v985_v4, %v162_v37  ;;  %v231_v45 = vadd.f32 %v985_v4, %v163_v38  ;;  %v232_v46 = vadd.f32 %v985_v4, %v164_v39 }
  0x24   :  { %v233_v50 = vadd.f32 %v985_v4, %v165_v43  ;;  %v234_v9 = vadd.f32 %v985_v4, %v166_v63  ;;  %v235_v10 = vadd.f32 %v985_v4, %v167_v0 }
  0x25   :  { %vm294_vm0 = vcmp.ge.f32.partialorder %v230_v44, 0.0  ;;  %vm295_vm1 = vcmp.ge.f32.partialorder %v231_v45, 0.0  ;;  %v358_v51 = vmul.f32 0.1, %v230_v44  ;;  %v359_v52 = vmul.f32 0.1, %v231_v45 }
  0x26   :  { %vm296_vm2 = vcmp.ge.f32.partialorder %v232_v46, 0.0  ;;  %vm297_vm3 = vcmp.ge.f32.partialorder %v233_v50, 0.0  ;;  %v360_v54 = vmul.f32 0.1, %v232_v46  ;;  %v361_v60 = vmul.f32 0.1, %v233_v50 }
  0x27   :  { %v422_v58 = vsel %vm294_vm0, %v230_v44, %v358_v51  ;;  %v423_v59 = vsel %vm295_vm1, %v231_v45, %v359_v52  ;;  %vm298_vm4 = vcmp.ge.f32.partialorder %v234_v9, 0.0  ;;  %vm299_vm5 = vcmp.ge.f32.partialorder %v235_v10, 0.0 }
  0x28   :  { %v900_v55 = vld [vmem:[%s1304_s0 + $0x58] sm:$0xff]   ;;  %v901_v56 = vld [vmem:[%s1304_s0 + $0x60] sm:$0xff]   ;;  %v773_v61 = vpack.c.bf16 %v423_v59, %v422_v58  ;;  %v424_v62 = vsel %vm296_vm2, %v232_v46, %v360_v54  ;;  %v902_v2 = vld [vmem:[%s1304_s0 + $0x68] sm:$0xff]   ;;  %v425_v3 = vsel %vm297_vm3, %v233_v50, %v361_v60  ;;  %v362_v16 = vmul.f32 0.1, %v234_v9 }
  0x29   :  { %927 = vst [vmem:[%s1307_s3 + $0x38] sm:$0xff] %v768_v57   ;;  %v648_v5 = vunpack.c.l.bf16 %v900_v55  ;;  %v649_v6 = vunpack.c.h.bf16 %v900_v55  ;;  %v652_v7 = vunpack.c.l.bf16 %v901_v56  ;;  %v778_v8 = vpack.c.bf16 %v425_v3, %v424_v62 }
  0x2a   :  { %928 = vst [vmem:[%s1307_s3 + $0x40] sm:$0xff] %v773_v61   ;;  %v653_v11 = vunpack.c.h.bf16 %v901_v56  ;;  %v656_v15 = vunpack.c.l.bf16 %v902_v2  ;;  %v363_v18 = vmul.f32 0.1, %v235_v10  ;;  %v426_v22 = vsel %vm298_vm4, %v234_v9, %v362_v16 }
  0x2b   :  { %v168_v12 = vmul.f32 %v980_v1, %v648_v5  ;;  %v169_v13 = vmul.f32 %v980_v1, %v649_v6  ;;  %v170_v14 = vmul.f32 %v980_v1, %v652_v7  ;;  %929 = vst [vmem:[%s1307_s3 + $0x48] sm:$0xff] %v778_v8   ;;  %v657_v24 = vunpack.c.h.bf16 %v902_v2 }
  0x2c   :  { %v171_v17 = vmul.f32 %v980_v1, %v653_v11  ;;  %v172_v25 = vmul.f32 %v980_v1, %v656_v15  ;;  %v427_v26 = vsel %vm299_vm5, %v235_v10, %v363_v18 }
  0x2d   :  { %v236_v19 = vadd.f32 %v985_v4, %v168_v12  ;;  %v237_v20 = vadd.f32 %v985_v4, %v169_v13  ;;  %v238_v21 = vadd.f32 %v985_v4, %v170_v14  ;;  %v783_v29 = vpack.c.bf16 %v427_v26, %v426_v22 }
  0x2e   :  { %v239_v23 = vadd.f32 %v985_v4, %v171_v17  ;;  %v173_v34 = vmul.f32 %v980_v1, %v657_v24  ;;  %v240_v36 = vadd.f32 %v985_v4, %v172_v25 }
  0x2f   :  { %vm300_vm6 = vcmp.ge.f32.partialorder %v236_v19, 0.0  ;;  %vm301_vm7 = vcmp.ge.f32.partialorder %v237_v20, 0.0  ;;  %v364_v27 = vmul.f32 0.1, %v236_v19  ;;  %v365_v30 = vmul.f32 0.1, %v237_v20 }
  0x30   :  { %vm302_vm8 = vcmp.ge.f32.partialorder %v238_v21, 0.0  ;;  %vm303_vm9 = vcmp.ge.f32.partialorder %v239_v23, 0.0  ;;  %v366_v32 = vmul.f32 0.1, %v238_v21  ;;  %v367_v33 = vmul.f32 0.1, %v239_v23 }
  0x31   :  { %v428_v31 = vsel %vm300_vm6, %v236_v19, %v364_v27  ;;  %v429_v35 = vsel %vm301_vm7, %v237_v20, %v365_v30  ;;  %v241_v43 = vadd.f32 %v985_v4, %v173_v34  ;;  %vm304_vm10 = vcmp.ge.f32.partialorder %v240_v36, 0.0 }
  0x32   :  { %v903_v28 = vld [vmem:[%s1304_s0 + $0x70] sm:$0xff]   ;;  %v788_v40 = vpack.c.bf16 %v429_v35, %v428_v31  ;;  %v430_v41 = vsel %vm302_vm8, %v238_v21, %v366_v32  ;;  %v431_v42 = vsel %vm303_vm9, %v239_v23, %v367_v33  ;;  %v368_v46 = vmul.f32 0.1, %v240_v36 }
  0x33   :  { %930 = vst [vmem:[%s1307_s3 + $0x50] sm:$0xff] %v783_v29   ;;  %v660_v37 = vunpack.c.l.bf16 %v903_v28  ;;  %v661_v38 = vunpack.c.h.bf16 %v903_v28  ;;  %v793_v45 = vpack.c.bf16 %v431_v42, %v430_v41  ;;  %vm305_vm11 = vcmp.ge.f32.partialorder %v241_v43, 0.0 }
  0x34   :  { %v369_v48 = vmul.f32 0.1, %v241_v43  ;;  %v432_v51 = vsel %vm304_vm10, %v240_v36, %v368_v46 }
  0x35   :  { %v174_v47 = vmul.f32 %v980_v1, %v660_v37  ;;  %v175_v49 = vmul.f32 %v980_v1, %v661_v38 }
  0x36   :  { %v433_v55 = vsel %vm305_vm11, %v241_v43, %v369_v48 }
  0x37   :  { %v242_v52 = vadd.f32 %v985_v4, %v174_v47  ;;  %v243_v56 = vadd.f32 %v985_v4, %v175_v49  ;;  %v798_v60 = vpack.c.bf16 %v433_v55, %v432_v51 }
  0x39   :  { %vm306_vm12 = vcmp.ge.f32.partialorder %v242_v52, 0.0  ;;  %v370_v61 = vmul.f32 0.1, %v242_v52  ;;  %vm307_vm13 = vcmp.ge.f32.partialorder %v243_v56, 0.0  ;;  %v371_v63 = vmul.f32 0.1, %v243_v56 }
  0x3a   :  { %v904_v39 = vld [vmem:[%s1304_s0 + $0x78] sm:$0xff]   ;;  %v905_v44 = vld [vmem:[%s1304_s0 + $0x80] sm:$0xff]  }
  0x3b   :  { %931 = vst [vmem:[%s1307_s3 + $0x58] sm:$0xff] %v788_v40   ;;  %v664_v50 = vunpack.c.l.bf16 %v904_v39  ;;  %v665_v53 = vunpack.c.h.bf16 %v904_v39  ;;  %v668_v54 = vunpack.c.l.bf16 %v905_v44  ;;  %v669_v58 = vunpack.c.h.bf16 %v905_v44 }
  0x3c   :  { %932 = vst [vmem:[%s1307_s3 + $0x60] sm:$0xff] %v793_v45   ;;  %v434_v3 = vsel %vm306_vm12, %v242_v52, %v370_v61  ;;  %v435_v8 = vsel %vm307_vm13, %v243_v56, %v371_v63 }
  0x3d   :  { %v176_v57 = vmul.f32 %v980_v1, %v664_v50  ;;  %v177_v62 = vmul.f32 %v980_v1, %v665_v53  ;;  %v178_v2 = vmul.f32 %v980_v1, %v668_v54  ;;  %v179_v6 = vmul.f32 %v980_v1, %v669_v58 }
  0x3e   :  { %v803_v11 = vpack.c.bf16 %v435_v8, %v434_v3 }
  0x3f   :  { %v244_v0 = vadd.f32 %v985_v4, %v176_v57  ;;  %v245_v5 = vadd.f32 %v985_v4, %v177_v62  ;;  %v246_v10 = vadd.f32 %v985_v4, %v178_v2  ;;  %v247_v13 = vadd.f32 %v985_v4, %v179_v6 }
  0x41   :  { %vm308_vm14 = vcmp.ge.f32.partialorder %v244_v0, 0.0  ;;  %v372_v9 = vmul.f32 0.1, %v244_v0  ;;  %vm309_vm15 = vcmp.ge.f32.partialorder %v245_v5, 0.0  ;;  %v373_v12 = vmul.f32 0.1, %v245_v5 }
  0x42   :  { %vm310_vm0 = vcmp.ge.f32.partialorder %v246_v10, 0.0  ;;  %v374_v16 = vmul.f32 0.1, %v246_v10  ;;  %vm311_vm1 = vcmp.ge.f32.partialorder %v247_v13, 0.0  ;;  %v375_v20 = vmul.f32 0.1, %v247_v13 }
  0x43   :  { %v906_v59 = vld [vmem:[%s1304_s0 + $0x88] sm:$0xff]   ;;  %v436_v15 = vsel %vm308_vm14, %v244_v0, %v372_v9  ;;  %v437_v19 = vsel %vm309_vm15, %v245_v5, %v373_v12 }
  0x44   :  { %933 = vst [vmem:[%s1307_s3 + $0x68] sm:$0xff] %v798_v60   ;;  %v672_v7 = vunpack.c.l.bf16 %v906_v59  ;;  %v673_v17 = vunpack.c.h.bf16 %v906_v59  ;;  %v808_v22 = vpack.c.bf16 %v437_v19, %v436_v15  ;;  %v438_v23 = vsel %vm310_vm0, %v246_v10, %v374_v16 }
  0x45   :  { %v439_v26 = vsel %vm311_vm1, %v247_v13, %v375_v20 }
  0x46   :  { %v180_v21 = vmul.f32 %v980_v1, %v672_v7  ;;  %v181_v24 = vmul.f32 %v980_v1, %v673_v17  ;;  %v813_v30 = vpack.c.bf16 %v439_v26, %v438_v23 }
  0x48   :  { %v248_v27 = vadd.f32 %v985_v4, %v180_v21  ;;  %v249_v31 = vadd.f32 %v985_v4, %v181_v24 }
  0x4a   :  { %vm312_vm2 = vcmp.ge.f32.partialorder %v248_v27, 0.0  ;;  %v376_v35 = vmul.f32 0.1, %v248_v27  ;;  %vm313_vm3 = vcmp.ge.f32.partialorder %v249_v31, 0.0  ;;  %v377_v38 = vmul.f32 0.1, %v249_v31 }
  0x4b   :  { %v907_v14 = vld [vmem:[%s1304_s0 + $0x90] sm:$0xff]   ;;  %v908_v18 = vld [vmem:[%s1304_s0 + $0x98] sm:$0xff]  }
  0x4c   :  { %934 = vst [vmem:[%s1307_s3 + $0x70] sm:$0xff] %v803_v11   ;;  %v676_v25 = vunpack.c.l.bf16 %v907_v14  ;;  %v677_v28 = vunpack.c.h.bf16 %v907_v14  ;;  %v680_v29 = vunpack.c.l.bf16 %v908_v18  ;;  %v681_v33 = vunpack.c.h.bf16 %v908_v18 }
  0x4d   :  { %935 = vst [vmem:[%s1307_s3 + $0x78] sm:$0xff] %v808_v22   ;;  %v440_v41 = vsel %vm312_vm2, %v248_v27, %v376_v35  ;;  %v441_v45 = vsel %vm313_vm3, %v249_v31, %v377_v38 }
  0x4e   :  { %v182_v32 = vmul.f32 %v980_v1, %v676_v25  ;;  %v183_v36 = vmul.f32 %v980_v1, %v677_v28  ;;  %v184_v37 = vmul.f32 %v980_v1, %v680_v29  ;;  %v185_v40 = vmul.f32 %v980_v1, %v681_v33 }
  0x4f   :  { %v818_v49 = vpack.c.bf16 %v441_v45, %v440_v41 }
  0x50   :  { %v250_v39 = vadd.f32 %v985_v4, %v182_v32  ;;  %v251_v42 = vadd.f32 %v985_v4, %v183_v36  ;;  %v252_v43 = vadd.f32 %v985_v4, %v184_v37  ;;  %v253_v47 = vadd.f32 %v985_v4, %v185_v40 }
  0x52   :  { %vm314_vm4 = vcmp.ge.f32.partialorder %v250_v39, 0.0  ;;  %v378_v46 = vmul.f32 0.1, %v250_v39  ;;  %vm315_vm5 = vcmp.ge.f32.partialorder %v251_v42, 0.0  ;;  %v379_v50 = vmul.f32 0.1, %v251_v42 }
  0x53   :  { %vm316_vm6 = vcmp.ge.f32.partialorder %v252_v43, 0.0  ;;  %vm317_vm7 = vcmp.ge.f32.partialorder %v253_v47, 0.0  ;;  %v380_v52 = vmul.f32 0.1, %v252_v43  ;;  %v381_v53 = vmul.f32 0.1, %v253_v47 }
  0x54   :  { %v909_v34 = vld [vmem:[%s1304_s0 + $0xa0] sm:$0xff]   ;;  %v442_v51 = vsel %vm314_vm4, %v250_v39, %v378_v46  ;;  %v443_v54 = vsel %vm315_vm5, %v251_v42, %v379_v50 }
  0x55   :  { %936 = vst [vmem:[%s1307_s3 + $0x80] sm:$0xff] %v813_v30   ;;  %v684_v44 = vunpack.c.l.bf16 %v909_v34  ;;  %v685_v55 = vunpack.c.h.bf16 %v909_v34  ;;  %v823_v60 = vpack.c.bf16 %v443_v54, %v442_v51  ;;  %v444_v61 = vsel %vm316_vm6, %v252_v43, %v380_v52 }
  0x56   :  { %v445_v62 = vsel %vm317_vm7, %v253_v47, %v381_v53 }
  0x57   :  { %v186_v56 = vmul.f32 %v980_v1, %v684_v44  ;;  %v828_v0 = vpack.c.bf16 %v445_v62, %v444_v61  ;;  %v187_v2 = vmul.f32 %v980_v1, %v685_v55 }
  0x59   :  { %v254_v3 = vadd.f32 %v985_v4, %v186_v56  ;;  %v255_v10 = vadd.f32 %v985_v4, %v187_v2 }
  0x5b   :  { %vm318_vm8 = vcmp.ge.f32.partialorder %v254_v3, 0.0  ;;  %v382_v11 = vmul.f32 0.1, %v254_v3  ;;  %vm319_vm9 = vcmp.ge.f32.partialorder %v255_v10, 0.0  ;;  %v383_v17 = vmul.f32 0.1, %v255_v10 }
  0x5c   :  { %v910_v48 = vld [vmem:[%s1304_s0 + $0xa8] sm:$0xff]  }
  0x5d   :  { %937 = vst [vmem:[%s1307_s3 + $0x88] sm:$0xff] %v818_v49   ;;  %v688_v57 = vunpack.c.l.bf16 %v910_v48  ;;  %v689_v63 = vunpack.c.h.bf16 %v910_v48  ;;  %v446_v18 = vsel %vm318_vm8, %v254_v3, %v382_v11  ;;  %v447_v22 = vsel %vm319_vm9, %v255_v10, %v383_v17 }
  0x5e   :  { %v833_v27 = vpack.c.bf16 %v447_v22, %v446_v18 }
  0x5f   :  { %v188_v5 = vmul.f32 %v980_v1, %v688_v57  ;;  %v189_v6 = vmul.f32 %v980_v1, %v689_v63 }
  0x61   :  { %v256_v12 = vadd.f32 %v985_v4, %v188_v5  ;;  %v257_v13 = vadd.f32 %v985_v4, %v189_v6 }
  0x63   :  { %vm320_vm10 = vcmp.ge.f32.partialorder %v256_v12, 0.0  ;;  %vm321_vm11 = vcmp.ge.f32.partialorder %v257_v13, 0.0  ;;  %v384_v19 = vmul.f32 0.1, %v256_v12  ;;  %v385_v20 = vmul.f32 0.1, %v257_v13 }
  0x64   :  { %v911_v58 = vld [vmem:[%s1304_s0 + $0xb0] sm:$0xff]   ;;  %v912_v59 = vld [vmem:[%s1304_s0 + $0xb8] sm:$0xff]  }
  0x65   :  { %938 = vst [vmem:[%s1307_s3 + $0x90] sm:$0xff] %v823_v60   ;;  %v692_v7 = vunpack.c.l.bf16 %v911_v58  ;;  %v693_v8 = vunpack.c.h.bf16 %v911_v58  ;;  %v696_v9 = vunpack.c.l.bf16 %v912_v59  ;;  %v697_v16 = vunpack.c.h.bf16 %v912_v59 }
  0x66   :  { %939 = vst [vmem:[%s1307_s3 + $0x98] sm:$0xff] %v828_v0   ;;  %v448_v28 = vsel %vm320_vm10, %v256_v12, %v384_v19  ;;  %v449_v29 = vsel %vm321_vm11, %v257_v13, %v385_v20 }
  0x67   :  { %v190_v14 = vmul.f32 %v980_v1, %v692_v7  ;;  %v191_v15 = vmul.f32 %v980_v1, %v693_v8  ;;  %v192_v24 = vmul.f32 %v980_v1, %v696_v9  ;;  %v193_v25 = vmul.f32 %v980_v1, %v697_v16 }
  0x68   :  { %v838_v31 = vpack.c.bf16 %v449_v29, %v448_v28 }
  0x69   :  { %v258_v21 = vadd.f32 %v985_v4, %v190_v14  ;;  %v259_v23 = vadd.f32 %v985_v4, %v191_v15  ;;  %v260_v34 = vadd.f32 %v985_v4, %v192_v24  ;;  %v261_v35 = vadd.f32 %v985_v4, %v193_v25 }
  0x6b   :  { %vm322_vm12 = vcmp.ge.f32.partialorder %v258_v21, 0.0  ;;  %vm323_vm13 = vcmp.ge.f32.partialorder %v259_v23, 0.0  ;;  %v386_v32 = vmul.f32 0.1, %v258_v21  ;;  %v387_v33 = vmul.f32 0.1, %v259_v23 }
  0x6c   :  { %vm324_vm14 = vcmp.ge.f32.partialorder %v260_v34, 0.0  ;;  %vm325_vm15 = vcmp.ge.f32.partialorder %v261_v35, 0.0  ;;  %v388_v44 = vmul.f32 0.1, %v260_v34  ;;  %v389_v45 = vmul.f32 0.1, %v261_v35 }
  0x6d   :  { %v913_v26 = vld [vmem:[%s1304_s0 + $0xc0] sm:$0xff]   ;;  %v914_v30 = vld [vmem:[%s1304_s0 + $0xc8] sm:$0xff]   ;;  %v450_v38 = vsel %vm322_vm12, %v258_v21, %v386_v32  ;;  %v451_v39 = vsel %vm323_vm13, %v259_v23, %v387_v33 }
  0x6e   :  { %940 = vst [vmem:[%s1307_s3 + $0xa0] sm:$0xff] %v833_v27   ;;  %v700_v36 = vunpack.c.l.bf16 %v913_v26  ;;  %v701_v37 = vunpack.c.h.bf16 %v913_v26  ;;  %v704_v40 = vunpack.c.l.bf16 %v914_v30  ;;  %v705_v41 = vunpack.c.h.bf16 %v914_v30 }
  0x6f   :  { %941 = vst [vmem:[%s1307_s3 + $0xa8] sm:$0xff] %v838_v31   ;;  %v843_v43 = vpack.c.bf16 %v451_v39, %v450_v38  ;;  %v452_v49 = vsel %vm324_vm14, %v260_v34, %v388_v44  ;;  %v453_v53 = vsel %vm325_vm15, %v261_v35, %v389_v45 }
  0x70   :  { %v194_v46 = vmul.f32 %v980_v1, %v700_v36  ;;  %v195_v47 = vmul.f32 %v980_v1, %v701_v37  ;;  %v196_v48 = vmul.f32 %v980_v1, %v704_v40  ;;  %v197_v50 = vmul.f32 %v980_v1, %v705_v41 }
  0x71   :  { %v848_v57 = vpack.c.bf16 %v453_v53, %v452_v49 }
  0x72   :  { %v262_v54 = vadd.f32 %v985_v4, %v194_v46  ;;  %v263_v55 = vadd.f32 %v985_v4, %v195_v47  ;;  %v264_v56 = vadd.f32 %v985_v4, %v196_v48  ;;  %v265_v58 = vadd.f32 %v985_v4, %v197_v50 }
  0x74   :  { %vm326_vm0 = vcmp.ge.f32.partialorder %v262_v54, 0.0  ;;  %vm327_vm1 = vcmp.ge.f32.partialorder %v263_v55, 0.0  ;;  %v390_v61 = vmul.f32 0.1, %v262_v54  ;;  %v391_v62 = vmul.f32 0.1, %v263_v55 }
  0x75   :  { %vm328_vm2 = vcmp.ge.f32.partialorder %v264_v56, 0.0  ;;  %vm329_vm3 = vcmp.ge.f32.partialorder %v265_v58, 0.0  ;;  %v392_v63 = vmul.f32 0.1, %v264_v56  ;;  %v393_v6 = vmul.f32 0.1, %v265_v58 }
  0x76   :  { %v915_v42 = vld [vmem:[%s1304_s0 + $0xd0] sm:$0xff]   ;;  %v454_v3 = vsel %vm326_vm0, %v262_v54, %v390_v61  ;;  %v455_v5 = vsel %vm327_vm1, %v263_v55, %v391_v62 }
  0x77   :  { %942 = vst [vmem:[%s1307_s3 + $0xb0] sm:$0xff] %v843_v43   ;;  %v708_v51 = vunpack.c.l.bf16 %v915_v42  ;;  %v709_v52 = vunpack.c.h.bf16 %v915_v42  ;;  %v853_v9 = vpack.c.bf16 %v455_v5, %v454_v3  ;;  %v456_v10 = vsel %vm328_vm2, %v264_v56, %v392_v63 }
  0x78   :  { %943 = vst [vmem:[%s1307_s3 + $0xb8] sm:$0xff] %v848_v57   ;;  %v457_v13 = vsel %vm329_vm3, %v265_v58, %v393_v6 }
  0x79   :  { %v198_v59 = vmul.f32 %v980_v1, %v708_v51  ;;  %v199_v60 = vmul.f32 %v980_v1, %v709_v52  ;;  %v858_v16 = vpack.c.bf16 %v457_v13, %v456_v10 }
  0x7b   :  { %v266_v0 = vadd.f32 %v985_v4, %v198_v59  ;;  %v267_v7 = vadd.f32 %v985_v4, %v199_v60 }
  0x7d   :  { %vm330_vm4 = vcmp.ge.f32.partialorder %v266_v0, 0.0  ;;  %v394_v11 = vmul.f32 0.1, %v266_v0  ;;  %vm331_vm5 = vcmp.ge.f32.partialorder %v267_v7, 0.0  ;;  %v395_v14 = vmul.f32 0.1, %v267_v7 }
  0x7f   :  { %v916_v2 = vld [vmem:[%s1304_s0 + $0xd8] sm:$0xff]   ;;  %v917_v8 = vld [vmem:[%s1304_s0 + $0xe0] sm:$0xff]   ;;  %v918_v12 = vld [vmem:[%s1304_s0 + $0xe8] sm:$0xff]   ;;  %v458_v17 = vsel %vm330_vm4, %v266_v0, %v394_v11  ;;  %v459_v21 = vsel %vm331_vm5, %v267_v7, %v395_v14 }
  0x80   :  { %v712_v15 = vunpack.c.l.bf16 %v916_v2  ;;  %944 = vst [vmem:[%s1307_s3 + $0xc0] sm:$0xff] %v853_v9   ;;  %v713_v18 = vunpack.c.h.bf16 %v916_v2  ;;  %v716_v19 = vunpack.c.l.bf16 %v917_v8  ;;  %v717_v23 = vunpack.c.h.bf16 %v917_v8 }
  0x81   :  { %v720_v24 = vunpack.c.l.bf16 %v918_v12  ;;  %v863_v25 = vpack.c.bf16 %v459_v21, %v458_v17  ;;  %v721_v28 = vunpack.c.h.bf16 %v918_v12 }
  0x82   :  { %v200_v22 = vmul.f32 %v980_v1, %v712_v15  ;;  %v201_v26 = vmul.f32 %v980_v1, %v713_v18  ;;  %v202_v27 = vmul.f32 %v980_v1, %v716_v19  ;;  %v203_v30 = vmul.f32 %v980_v1, %v717_v23 }
  0x83   :  { %v204_v31 = vmul.f32 %v980_v1, %v720_v24  ;;  %v205_v35 = vmul.f32 %v980_v1, %v721_v28 }
  0x84   :  { %v268_v29 = vadd.f32 %v985_v4, %v200_v22  ;;  %v269_v33 = vadd.f32 %v985_v4, %v201_v26  ;;  %v270_v34 = vadd.f32 %v985_v4, %v202_v27  ;;  %v271_v38 = vadd.f32 %v985_v4, %v203_v30 }
  0x85   :  { %v272_v39 = vadd.f32 %v985_v4, %v204_v31  ;;  %v273_v44 = vadd.f32 %v985_v4, %v205_v35 }
  0x86   :  { %vm332_vm6 = vcmp.ge.f32.partialorder %v268_v29, 0.0  ;;  %v396_v37 = vmul.f32 0.1, %v268_v29  ;;  %vm333_vm7 = vcmp.ge.f32.partialorder %v269_v33, 0.0  ;;  %v397_v40 = vmul.f32 0.1, %v269_v33 }
  0x87   :  { %v919_v20 = vld [vmem:[%s1304_s0 + $0xf0] sm:$0xff]   ;;  %vm334_vm8 = vcmp.ge.f32.partialorder %v270_v34, 0.0  ;;  %v398_v41 = vmul.f32 0.1, %v270_v34  ;;  %vm335_vm9 = vcmp.ge.f32.partialorder %v271_v38, 0.0  ;;  %vm336_vm10 = vcmp.ge.f32.partialorder %v272_v39, 0.0 }
  0x88   :  { %945 = vst [vmem:[%s1307_s3 + $0xc8] sm:$0xff] %v858_v16   ;;  %v724_v32 = vunpack.c.l.bf16 %v919_v20  ;;  %v725_v36 = vunpack.c.h.bf16 %v919_v20  ;;  %v460_v42 = vsel %vm332_vm6, %v268_v29, %v396_v37  ;;  %v399_v43 = vmul.f32 0.1, %v271_v38 }
  0x89   :  { %946 = vst [vmem:[%s1307_s3 + $0xd0] sm:$0xff] %v863_v25   ;;  %v461_v45 = vsel %vm333_vm7, %v269_v33, %v397_v40  ;;  %v462_v46 = vsel %vm334_vm8, %v270_v34, %v398_v41  ;;  %v400_v47 = vmul.f32 0.1, %v272_v39  ;;  %vm337_vm11 = vcmp.ge.f32.partialorder %v273_v44, 0.0 }
  0x8a   :  { %v868_v49 = vpack.c.bf16 %v461_v45, %v460_v42  ;;  %v463_v50 = vsel %vm335_vm9, %v271_v38, %v399_v43  ;;  %v401_v51 = vmul.f32 0.1, %v273_v44  ;;  %v206_v54 = vmul.f32 %v980_v1, %v724_v32 }
  0x8b   :  { %v873_v52 = vpack.c.bf16 %v463_v50, %v462_v46  ;;  %v464_v53 = vsel %vm336_vm10, %v272_v39, %v400_v47  ;;  %v207_v55 = vmul.f32 %v980_v1, %v725_v36 }
  0x8c   :  { %v465_v56 = vsel %vm337_vm11, %v273_v44, %v401_v51  ;;  %v274_v60 = vadd.f32 %v985_v4, %v206_v54 }
  0x8d   :  { %v878_v59 = vpack.c.bf16 %v465_v56, %v464_v53  ;;  %v275_v61 = vadd.f32 %v985_v4, %v207_v55 }
  0x8e   :  { %vm338_vm12 = vcmp.ge.f32.partialorder %v274_v60, 0.0  ;;  %v402_v0 = vmul.f32 0.1, %v274_v60 }
  0x8f   :  { %vm339_vm13 = vcmp.ge.f32.partialorder %v275_v61, 0.0  ;;  %v403_v2 = vmul.f32 0.1, %v275_v61 }
  0x90   :  { %v920_v48 = vld [vmem:[%s1304_s0 + $0xf8] sm:$0xff]   ;;  %v466_v6 = vsel %vm338_vm12, %v274_v60, %v402_v0 }
  0x91   :  { %947 = vst [vmem:[%s1307_s3 + $0xd8] sm:$0xff] %v868_v49   ;;  %v728_v57 = vunpack.c.l.bf16 %v920_v48  ;;  %v729_v58 = vunpack.c.h.bf16 %v920_v48  ;;  %v467_v7 = vsel %vm339_vm13, %v275_v61, %v403_v2 }
  0x92   :  { %948 = vst [vmem:[%s1307_s3 + $0xe0] sm:$0xff] %v873_v52   ;;  %v883_v9 = vpack.c.bf16 %v467_v7, %v466_v6 }
  0x93   :  { %v208_v62 = vmul.f32 %v980_v1, %v728_v57  ;;  %v209_v63 = vmul.f32 %v980_v1, %v729_v58  ;;  %949 = vst [vmem:[%s1307_s3 + $0xe8] sm:$0xff] %v878_v59  }
  0x94   :  { %950 = vst [vmem:[%s1307_s3 + $0xf0] sm:$0xff] %v883_v9  }
  0x95   :  { %v276_v3 = vadd.f32 %v985_v4, %v208_v62  ;;  %v277_v5 = vadd.f32 %v985_v4, %v209_v63 }
  0x97   :  { %vm340_vm14 = vcmp.ge.f32.partialorder %v276_v3, 0.0  ;;  %vm341_vm15 = vcmp.ge.f32.partialorder %v277_v5, 0.0  ;;  %v404_v8 = vmul.f32 0.1, %v276_v3  ;;  %v405_v10 = vmul.f32 0.1, %v277_v5 }
  0x99   :  { %v468_v1 = vsel %vm340_vm14, %v276_v3, %v404_v8  ;;  %v469_v11 = vsel %vm341_vm15, %v277_v5, %v405_v10 }
  0x9a   :  { %v888_v12 = vpack.c.bf16 %v469_v11, %v468_v1 }
  0x9c   :  { %951 = vst [vmem:[%s1307_s3 + $0xf8] sm:$0xff] %v888_v12  }

// kernel: conv2d_wsn_forward.2
= control target key start
LH: loop header
LB: loop body
LE: loop exit
PB: predicated region body
PF: predicated region fallthrough
CT: control target
= control target key end

     0   :  { %vm832_vm0 = vcmask 1040384   ;;  %vm834_vm1 = vcmask 1041408   ;;  %s1787_s1 = inlined_call_operand.vmem [shape: bf16[128,128], index: 1, kind: input, shape index: {}]   ;;  %s1788_s0 = inlined_call_operand.vmem [shape: bf16[512,128], index: 0, kind: input, shape index: {}]   ;;  %s1789_s2 = inlined_call_operand.vmem [shape: bf16[512,128], index: 2, kind: output, shape index: {0}]   ;;  %s1790_s3 = inlined_call_operand.vmem [shape: f32[1,8,128], index: 3, kind: output, shape index: {1}]  }
   0x1   :  { %v1044_v0 = vld [vmem:[%s1787_s1 + $0x38] sm:$0xff]  ;;  %v1043_v1 = vld [vmem:[%s1787_s1 + $0x30] sm:$0xff]  ;;  %v1042_v2 = vld [vmem:[%s1787_s1 + $0x28] sm:$0xff] }
   0x2   :  { %333 = vmatpush.bf16.msra.mxu0 %v1044_v0  ;;  %1236 = vmatpush.bf16.msra.mxu1 %v1044_v0  ;;  %v1041_v3 = vld [vmem:[%s1787_s1 + $0x20] sm:$0xff]  ;;  %v1040_v4 = vld [vmem:[%s1787_s1 + $0x18] sm:$0xff]  ;;  %v1039_v5 = vld [vmem:[%s1787_s1 + $0x10] sm:$0xff] }
   0x3   :  { %1237 = vmatpush.bf16.msra.mxu2 %v1044_v0  ;;  %1238 = vmatpush.bf16.msra.mxu3 %v1044_v0  ;;  %v1038_v6 = vld [vmem:[%s1787_s1 + $0x8] sm:$0xff]  ;;  %v1037_v7 = vld [vmem:[%s1787_s1] sm:$0xff]  ;;  %v1007_v13 = vld [vmem:[%s1788_s0 + $0x10] sm:$0xff] }
   0x4   :  { %v1005_v8 = vld [vmem:[%s1788_s0] sm:$0xff]  ;;  %v1006_v10 = vld [vmem:[%s1788_s0 + $0x8] sm:$0xff]  ;;  %v1015_v14 = vld [vmem:[%s1788_s0 + $0x50] sm:$0xff] }
   0x5   :  { %v1013_v9 = vld [vmem:[%s1788_s0 + $0x40] sm:$0xff]  ;;  %v1014_v11 = vld [vmem:[%s1788_s0 + $0x48] sm:$0xff]  ;;  %v1008_v16 = vld [vmem:[%s1788_s0 + $0x18] sm:$0xff] }
   0x6   :  { %334 = vmatpush.bf16.msra.mxu0 %v1043_v1  ;;  %1239 = vmatpush.bf16.msra.mxu1 %v1043_v1  ;;  %v1021_v12 = vld [vmem:[%s1788_s0 + $0x80] sm:$0xff]  ;;  %v1022_v15 = vld [vmem:[%s1788_s0 + $0x88] sm:$0xff]  ;;  %v1016_v17 = vld [vmem:[%s1788_s0 + $0x58] sm:$0xff] }
   0x7   :  { %1240 = vmatpush.bf16.msra.mxu2 %v1043_v1  ;;  %1241 = vmatpush.bf16.msra.mxu3 %v1043_v1  ;;  %v1023_v18 = vld [vmem:[%s1788_s0 + $0x90] sm:$0xff]  ;;  %v1029_v19 = vld [vmem:[%s1788_s0 + $0xc0] sm:$0xff]  ;;  %v1024_v22 = vld [vmem:[%s1788_s0 + $0x98] sm:$0xff] }
   0x8   :  { %v1009_v20 = vld [vmem:[%s1788_s0 + $0x20] sm:$0xff]  ;;  %v1030_v23 = vld [vmem:[%s1788_s0 + $0xc8] sm:$0xff]  ;;  %v1031_v27 = vld [vmem:[%s1788_s0 + $0xd0] sm:$0xff] }
   0x9   :  { %v1017_v21 = vld [vmem:[%s1788_s0 + $0x60] sm:$0xff]  ;;  %v1010_v24 = vld [vmem:[%s1788_s0 + $0x28] sm:$0xff]  ;;  %v1011_v28 = vld [vmem:[%s1788_s0 + $0x30] sm:$0xff] }
   0xa   :  { %335 = vmatpush.bf16.msra.mxu0 %v1042_v2  ;;  %1242 = vmatpush.bf16.msra.mxu1 %v1042_v2  ;;  %v1018_v25 = vld [vmem:[%s1788_s0 + $0x68] sm:$0xff]  ;;  %v1025_v26 = vld [vmem:[%s1788_s0 + $0xa0] sm:$0xff]  ;;  %v1019_v29 = vld [vmem:[%s1788_s0 + $0x70] sm:$0xff] }
   0xb   :  { %1243 = vmatpush.bf16.msra.mxu2 %v1042_v2  ;;  %1244 = vmatpush.bf16.msra.mxu3 %v1042_v2  ;;  %v1026_v30 = vld [vmem:[%s1788_s0 + $0xa8] sm:$0xff]  ;;  %v1032_v31 = vld [vmem:[%s1788_s0 + $0xd8] sm:$0xff]  ;;  %v1027_v34 = vld [vmem:[%s1788_s0 + $0xb0] sm:$0xff] }
   0xc   :  { %v1012_v32 = vld [vmem:[%s1788_s0 + $0x38] sm:$0xff]  ;;  %v1033_v35 = vld [vmem:[%s1788_s0 + $0xe0] sm:$0xff]  ;;  %v1034_v39 = vld [vmem:[%s1788_s0 + $0xe8] sm:$0xff] }
   0xd   :  { %v1020_v33 = vld [vmem:[%s1788_s0 + $0x78] sm:$0xff]  ;;  %v1035_v53 = vld [vmem:[%s1788_s0 + $0xf0] sm:$0xff] }
   0xe   :  { %336 = vmatpush.bf16.msra.mxu0 %v1041_v3  ;;  %1245 = vmatpush.bf16.msra.mxu1 %v1041_v3  ;;  %v1028_v38 = vld [vmem:[%s1788_s0 + $0xb8] sm:$0xff] }
   0xf   :  { %1246 = vmatpush.bf16.msra.mxu2 %v1041_v3  ;;  %1247 = vmatpush.bf16.msra.mxu3 %v1041_v3 }
  0x12   :  { %337 = vmatpush.bf16.msra.mxu0 %v1040_v4  ;;  %1248 = vmatpush.bf16.msra.mxu1 %v1040_v4 }
  0x13   :  { %1249 = vmatpush.bf16.msra.mxu2 %v1040_v4  ;;  %1250 = vmatpush.bf16.msra.mxu3 %v1040_v4 }
  0x16   :  { %338 = vmatpush.bf16.msra.mxu0 %v1039_v5  ;;  %1251 = vmatpush.bf16.msra.mxu1 %v1039_v5 }
  0x17   :  { %1252 = vmatpush.bf16.msra.mxu2 %v1039_v5  ;;  %1253 = vmatpush.bf16.msra.mxu3 %v1039_v5  ;;  %v1036_v5 = vld [vmem:[%s1788_s0 + $0xf8] sm:$0xff] }
  0x1a   :  { %339 = vmatpush.bf16.msra.mxu0 %v1038_v6  ;;  %1254 = vmatpush.bf16.msra.mxu1 %v1038_v6 }
  0x1b   :  { %1255 = vmatpush.bf16.msra.mxu2 %v1038_v6  ;;  %1256 = vmatpush.bf16.msra.mxu3 %v1038_v6 }
  0x1e   :  { %340 = vmatpush.bf16.msra.mxu0 %v1037_v7  ;;  %1257 = vmatpush.bf16.msra.mxu1 %v1037_v7 }
  0x1f   :  { %1258 = vmatpush.bf16.msra.mxu2 %v1037_v7  ;;  %1259 = vmatpush.bf16.msra.mxu3 %v1037_v7 }
  0x21   :  { %341 = vmatmul.bf16.vlgmr.msra.gmra.mxu0 %v1005_v8  ;;  %381 = vmatmul.bf16.vlgmr.msra.gmra.mxu1 %v1013_v9 }
  0x22   :  { %421 = vmatmul.bf16.vlgmr.msra.gmra.mxu2 %v1021_v12  ;;  %461 = vmatmul.bf16.vlgmr.msra.gmra.mxu3 %v1029_v19 }
  0x31   :  { %346 = vmatmul.bf16.gmra.mxu0 %v1006_v10  ;;  %386 = vmatmul.bf16.gmra.mxu1 %v1014_v11 }
  0x32   :  { %426 = vmatmul.bf16.gmra.mxu2 %v1022_v15  ;;  %466 = vmatmul.bf16.gmra.mxu3 %v1030_v23 }
  0x41   :  { %351 = vmatmul.bf16.gmra.mxu0 %v1007_v13  ;;  %391 = vmatmul.bf16.gmra.mxu1 %v1015_v14 }
  0x42   :  { %431 = vmatmul.bf16.gmra.mxu2 %v1023_v18  ;;  %471 = vmatmul.bf16.gmra.mxu3 %v1031_v27 }
  0x51   :  { %356 = vmatmul.bf16.gmra.mxu0 %v1008_v16  ;;  %396 = vmatmul.bf16.gmra.mxu1 %v1016_v17 }
  0x52   :  { %436 = vmatmul.bf16.gmra.mxu2 %v1024_v22  ;;  %476 = vmatmul.bf16.gmra.mxu3 %v1032_v31 }
  0x61   :  { %361 = vmatmul.bf16.gmra.mxu0 %v1009_v20  ;;  %401 = vmatmul.bf16.gmra.mxu1 %v1017_v21 }
  0x62   :  { %441 = vmatmul.bf16.gmra.mxu2 %v1025_v26  ;;  %481 = vmatmul.bf16.gmra.mxu3 %v1033_v35 }
  0x71   :  { %366 = vmatmul.bf16.gmra.mxu0 %v1010_v24  ;;  %406 = vmatmul.bf16.gmra.mxu1 %v1018_v25 }
  0x72   :  { %446 = vmatmul.bf16.gmra.mxu2 %v1026_v30  ;;  %486 = vmatmul.bf16.gmra.mxu3 %v1034_v39 }
  0x81   :  { %371 = vmatmul.bf16.gmra.mxu0 %v1011_v28  ;;  %411 = vmatmul.bf16.gmra.mxu1 %v1019_v29 }
  0x82   :  { %451 = vmatmul.bf16.gmra.mxu2 %v1027_v34  ;;  %491 = vmatmul.bf16.gmra.mxu3 %v1035_v53 }
  0x91   :  { %376 = vmatmul.bf16.gmra.mxu0 %v1012_v32  ;;  %416 = vmatmul.bf16.gmra.mxu1 %v1020_v33 }
  0x92   :  { %456 = vmatmul.bf16.gmra.mxu2 %v1028_v38  ;;  %496 = vmatmul.bf16.gmra.mxu3 %v1036_v5 }
  0x9e   :  { %v342_v36 = vpop.f32.mrf.mxu0  ;;  %v1388_v37 = vpop.f32.mrf.mxu1 }
  0x9f   :  { %v699_v40 = vmul.f32 %v342_v36, %v342_v36 }
  0xa5   :  { %v1415_v60 = vpop.f32.mrf.mxu2  ;;  %v1466_v20 = vpop.f32.mrf.mxu3 }
  0xa6   :  { %v344_v41 = vpop.f32.mrf.mxu0  ;;  %v1396_v42 = vpop.f32.mrf.mxu1 }
  0xa7   :  { %v1048_v43 = vpack.c.bf16 %v344_v41, %v342_v36  ;;  %v630_v44 = vadd.f32 %v344_v41, %v342_v36  ;;  %v700_v45 = vmul.f32 %v344_v41, %v344_v41  ;;  %v1088_v46 = vpack.c.bf16 %v1396_v42, %v1388_v37 }
  0xa9   :  { %1049 = vst [vmem:[%s1789_s2] sm:$0xff] %v1048_v43   ;;  %v763_v47 = vadd.f32 %v700_v45, %v699_v40 }
  0xaa   :  { %1212 = vst [vmem:[%s1789_s2 + $0x40] sm:$0xff] %v1088_v46  }
  0xad   :  { %v1427_v2 = vpop.f32.mrf.mxu2  ;;  %v1478_v24 = vpop.f32.mrf.mxu3 }
  0xae   :  { %v347_v48 = vpop.f32.mrf.mxu0  ;;  %v1406_v49 = vpop.f32.mrf.mxu1  ;;  %v1128_v3 = vpack.c.bf16 %v1427_v2, %v1415_v60  ;;  %v1168_v26 = vpack.c.bf16 %v1478_v24, %v1466_v20 }
  0xaf   :  { %v631_v50 = vadd.f32 %v630_v44, %v347_v48  ;;  %v701_v51 = vmul.f32 %v347_v48, %v347_v48 }
  0xb0   :  { %1220 = vst [vmem:[%s1789_s2 + $0x80] sm:$0xff] %v1128_v3  }
  0xb1   :  { %v764_v52 = vadd.f32 %v763_v47, %v701_v51  ;;  %1228 = vst [vmem:[%s1789_s2 + $0xc0] sm:$0xff] %v1168_v26  }
  0xb5   :  { %v1443_v10 = vpop.f32.mrf.mxu2  ;;  %v1496_v32 = vpop.f32.mrf.mxu3 }
  0xb6   :  { %v349_v54 = vpop.f32.mrf.mxu0  ;;  %v1411_v55 = vpop.f32.mrf.mxu1 }
  0xb7   :  { %v1053_v56 = vpack.c.bf16 %v349_v54, %v347_v48  ;;  %v632_v57 = vadd.f32 %v631_v50, %v349_v54  ;;  %v702_v58 = vmul.f32 %v349_v54, %v349_v54  ;;  %v1093_v59 = vpack.c.bf16 %v1411_v55, %v1406_v49 }
  0xb9   :  { %1205 = vst [vmem:[%s1789_s2 + $0x8] sm:$0xff] %v1053_v56   ;;  %v765_v61 = vadd.f32 %v764_v52, %v702_v58 }
  0xba   :  { %1213 = vst [vmem:[%s1789_s2 + $0x48] sm:$0xff] %v1093_v59  }
  0xbd   :  { %v1453_v13 = vpop.f32.mrf.mxu2  ;;  %v1508_v36 = vpop.f32.mrf.mxu3 }
  0xbe   :  { %v352_v62 = vpop.f32.mrf.mxu0  ;;  %v1423_v63 = vpop.f32.mrf.mxu1  ;;  %v1133_v14 = vpack.c.bf16 %v1453_v13, %v1443_v10  ;;  %v1173_v39 = vpack.c.bf16 %v1508_v36, %v1496_v32 }
  0xbf   :  { %v1425_v0 = vadd.f32 %v632_v57, %v352_v62  ;;  %v703_v1 = vmul.f32 %v352_v62, %v352_v62 }
  0xc0   :  { %1221 = vst [vmem:[%s1789_s2 + $0x88] sm:$0xff] %v1133_v14  }
  0xc1   :  { %v1431_v4 = vadd.f32 %v765_v61, %v703_v1  ;;  %1229 = vst [vmem:[%s1789_s2 + $0xc8] sm:$0xff] %v1173_v39  }
  0xc5   :  { %v1464_v19 = vpop.f32.mrf.mxu2  ;;  %v1526_v46 = vpop.f32.mrf.mxu3 }
  0xc6   :  { %v354_v6 = vpop.f32.mrf.mxu0  ;;  %v1439_v7 = vpop.f32.mrf.mxu1 }
  0xc7   :  { %v1058_v8 = vpack.c.bf16 %v354_v6, %v352_v62  ;;  %v1098_v9 = vpack.c.bf16 %v1439_v7, %v1423_v63  ;;  %v704_v52 = vmul.f32 %v354_v6, %v354_v6  ;;  %v634_v57 = vadd.f32 %v1425_v0, %v354_v6 }
  0xc9   :  { %1206 = vst [vmem:[%s1789_s2 + $0x10] sm:$0xff] %v1058_v8   ;;  %v767_v58 = vadd.f32 %v1431_v4, %v704_v52 }
  0xca   :  { %1214 = vst [vmem:[%s1789_s2 + $0x50] sm:$0xff] %v1098_v9  }
  0xcd   :  { %v1476_v23 = vpop.f32.mrf.mxu2  ;;  %v1538_v51 = vpop.f32.mrf.mxu3 }
  0xce   :  { %v357_v11 = vpop.f32.mrf.mxu0  ;;  %v1451_v12 = vpop.f32.mrf.mxu1  ;;  %v1138_v25 = vpack.c.bf16 %v1476_v23, %v1464_v19  ;;  %v1178_v54 = vpack.c.bf16 %v1538_v51, %v1526_v46 }
  0xcf   :  { %v705_v56 = vmul.f32 %v357_v11, %v357_v11  ;;  %v635_v61 = vadd.f32 %v634_v57, %v357_v11 }
  0xd0   :  { %1222 = vst [vmem:[%s1789_s2 + $0x90] sm:$0xff] %v1138_v25  }
  0xd1   :  { %1230 = vst [vmem:[%s1789_s2 + $0xd0] sm:$0xff] %v1178_v54   ;;  %v768_v62 = vadd.f32 %v767_v58, %v705_v56 }
  0xd5   :  { %v1494_v31 = vpop.f32.mrf.mxu2  ;;  %v1558_v0 = vpop.f32.mrf.mxu3 }
  0xd6   :  { %v359_v15 = vpop.f32.mrf.mxu0  ;;  %v1460_v16 = vpop.f32.mrf.mxu1 }
  0xd7   :  { %v1063_v17 = vpack.c.bf16 %v359_v15, %v357_v11  ;;  %v1103_v18 = vpack.c.bf16 %v1460_v16, %v1451_v12  ;;  %v706_v59 = vmul.f32 %v359_v15, %v359_v15  ;;  %v636_v8 = vadd.f32 %v635_v61, %v359_v15 }
  0xd9   :  { %1207 = vst [vmem:[%s1789_s2 + $0x18] sm:$0xff] %v1063_v17   ;;  %v769_v6 = vadd.f32 %v768_v62, %v706_v59 }
  0xda   :  { %1215 = vst [vmem:[%s1789_s2 + $0x58] sm:$0xff] %v1103_v18  }
  0xdd   :  { %v1506_v35 = vpop.f32.mrf.mxu2 }
  0xde   :  { %v362_v21 = vpop.f32.mrf.mxu0  ;;  %v1474_v22 = vpop.f32.mrf.mxu1  ;;  %v1143_v38 = vpack.c.bf16 %v1506_v35, %v1494_v31 }
  0xdf   :  { %v707_v1 = vmul.f32 %v362_v21, %v362_v21  ;;  %v637_v25 = vadd.f32 %v636_v8, %v362_v21 }
  0xe0   :  { %1223 = vst [vmem:[%s1789_s2 + $0x98] sm:$0xff] %v1143_v38  }
  0xe1   :  { %v770_v4 = vadd.f32 %v769_v6, %v707_v1 }
  0xe5   :  { %v1524_v45 = vpop.f32.mrf.mxu2 }
  0xe6   :  { %v364_v27 = vpop.f32.mrf.mxu0  ;;  %v1490_v28 = vpop.f32.mrf.mxu1 }
  0xe7   :  { %v1068_v29 = vpack.c.bf16 %v364_v27, %v362_v21  ;;  %v1108_v30 = vpack.c.bf16 %v1490_v28, %v1474_v22  ;;  %v708_v18 = vmul.f32 %v364_v27, %v364_v27  ;;  %v638_v15 = vadd.f32 %v637_v25, %v364_v27 }
  0xe9   :  { %1208 = vst [vmem:[%s1789_s2 + $0x20] sm:$0xff] %v1068_v29   ;;  %v771_v26 = vadd.f32 %v770_v4, %v708_v18 }
  0xea   :  { %1216 = vst [vmem:[%s1789_s2 + $0x60] sm:$0xff] %v1108_v30  }
  0xed   :  { %v1536_v50 = vpop.f32.mrf.mxu2 }
  0xee   :  { %v367_v33 = vpop.f32.mrf.mxu0  ;;  %v1504_v34 = vpop.f32.mrf.mxu1  ;;  %v1148_v53 = vpack.c.bf16 %v1536_v50, %v1524_v45 }
  0xef   :  { %v709_v11 = vmul.f32 %v367_v33, %v367_v33  ;;  %v639_v30 = vadd.f32 %v638_v15, %v367_v33 }
  0xf0   :  { %1224 = vst [vmem:[%s1789_s2 + $0xa0] sm:$0xff] %v1148_v53   ;;  %v1570_v53 = vpop.f32.mrf.mxu3 }
  0xf1   :  { %v772_v38 = vadd.f32 %v771_v26, %v709_v11  ;;  %v1183_v27 = vpack.c.bf16 %v1570_v53, %v1558_v0  ;;  %v716_v26 = vmul.f32 %v1396_v42, %v1396_v42 }
  0xf3   :  { %1231 = vst [vmem:[%s1789_s2 + $0xd8] sm:$0xff] %v1183_v27  }
  0xf5   :  { %v1556_v17 = vpop.f32.mrf.mxu2 }
  0xf6   :  { %v369_v40 = vpop.f32.mrf.mxu0  ;;  %v1520_v41 = vpop.f32.mrf.mxu1 }
  0xf7   :  { %v1073_v43 = vpack.c.bf16 %v369_v40, %v367_v33  ;;  %v1113_v44 = vpack.c.bf16 %v1520_v41, %v1504_v34  ;;  %v710_v29 = vmul.f32 %v369_v40, %v369_v40  ;;  %v640_v21 = vadd.f32 %v639_v30, %v369_v40 }
  0xf8   :  { %v1588_v4 = vpop.f32.mrf.mxu3 }
  0xf9   :  { %1209 = vst [vmem:[%s1789_s2 + $0x28] sm:$0xff] %v1073_v43   ;;  %v773_v54 = vadd.f32 %v772_v38, %v710_v29  ;;  %v717_v38 = vmul.f32 %v1406_v49, %v1406_v49 }
  0xfa   :  { %1217 = vst [vmem:[%s1789_s2 + $0x68] sm:$0xff] %v1113_v44  }
  0xfd   :  { %v1568_v52 = vpop.f32.mrf.mxu2 }
  0xfe   :  { %v372_v47 = vpop.f32.mrf.mxu0  ;;  %v1534_v48 = vpop.f32.mrf.mxu1  ;;  %v1153_v57 = vpack.c.bf16 %v1568_v52, %v1556_v17 }
  0xff   :  { %v711_v39 = vmul.f32 %v372_v47, %v372_v47  ;;  %v641_v58 = vadd.f32 %v640_v21, %v372_v47 }
 0x100   :  { %1225 = vst [vmem:[%s1789_s2 + $0xa8] sm:$0xff] %v1153_v57   ;;  %v1610_v57 = vpop.f32.mrf.mxu3 }
 0x101   :  { %v774_v33 = vadd.f32 %v773_v54, %v711_v39  ;;  %v1188_v27 = vpack.c.bf16 %v1610_v57, %v1588_v4 }
 0x103   :  { %1232 = vst [vmem:[%s1789_s2 + $0xe0] sm:$0xff] %v1188_v27  }
 0x105   :  { %v1586_v25 = vpop.f32.mrf.mxu2 }
 0x106   :  { %v374_v3 = vpop.f32.mrf.mxu0  ;;  %v1552_v5 = vpop.f32.mrf.mxu1 }
 0x107   :  { %v1078_v9 = vpack.c.bf16 %v374_v3, %v372_v47  ;;  %v1118_v14 = vpack.c.bf16 %v1552_v5, %v1534_v48  ;;  %v712_v56 = vmul.f32 %v374_v3, %v374_v3  ;;  %v642_v40 = vadd.f32 %v641_v58, %v374_v3 }
 0x108   :  { %v715_v3 = vmul.f32 %v1388_v37, %v1388_v37  ;;  %v728_v27 = vmul.f32 %v1552_v5, %v1552_v5 }
 0x109   :  { %1210 = vst [vmem:[%s1789_s2 + $0x30] sm:$0xff] %v1078_v9   ;;  %v775_v61 = vadd.f32 %v774_v33, %v712_v56 }
 0x10a   :  { %1218 = vst [vmem:[%s1789_s2 + $0x70] sm:$0xff] %v1118_v14  }
 0x10d   :  { %v1608_v56 = vpop.f32.mrf.mxu2 }
 0x10e   :  { %v377_v43 = vpop.f32.mrf.mxu0  ;;  %v1566_v44 = vpop.f32.mrf.mxu1 }
 0x10f   :  { %v713_v59 = vmul.f32 %v377_v43, %v377_v43  ;;  %v643_v62 = vadd.f32 %v642_v40, %v377_v43 }
 0x111   :  { %v776_v1 = vadd.f32 %v775_v61, %v713_v59  ;;  %v721_v61 = vmul.f32 %v1451_v12, %v1451_v12 }
 0x116   :  { %v379_v8 = vpop.f32.mrf.mxu0  ;;  %v1582_v9 = vpop.f32.mrf.mxu1 }
 0x117   :  { %v1083_v14 = vpack.c.bf16 %v379_v8, %v377_v43  ;;  %v644_v6 = vadd.f32 %v643_v62, %v379_v8  ;;  %v714_v47 = vmul.f32 %v379_v8, %v379_v8  ;;  %v1123_v18 = vpack.c.bf16 %v1582_v9, %v1566_v44 }
 0x119   :  { %1211 = vst [vmem:[%s1789_s2 + $0x38] sm:$0xff] %v1083_v14   ;;  %v645_v11 = vadd.f32 %v644_v6, %v1388_v37  ;;  %v777_v15 = vadd.f32 %v776_v1, %v714_v47  ;;  %v718_v37 = vmul.f32 %v1411_v55, %v1411_v55  ;;  %v722_v1 = vmul.f32 %v1460_v16, %v1460_v16  ;;  %v1634_v6 = vpop.f32.mrf.mxu2 }
 0x11a   :  { %1219 = vst [vmem:[%s1789_s2 + $0x78] sm:$0xff] %v1123_v18   ;;  %v723_v47 = vmul.f32 %v1474_v22, %v1474_v22 }
 0x11b   :  { %v646_v29 = vadd.f32 %v645_v11, %v1396_v42  ;;  %v778_v30 = vadd.f32 %v777_v15, %v715_v3  ;;  %v1158_v42 = vpack.c.bf16 %v1608_v56, %v1586_v25  ;;  %v724_v11 = vmul.f32 %v1490_v28, %v1490_v28 }
 0x11d   :  { %v647_v39 = vadd.f32 %v646_v29, %v1406_v49  ;;  %v779_v43 = vadd.f32 %v778_v30, %v716_v26  ;;  %v719_v49 = vmul.f32 %v1423_v63, %v1423_v63  ;;  %1226 = vst [vmem:[%s1789_s2 + $0xb0] sm:$0xff] %v1158_v42   ;;  %v726_v30 = vmul.f32 %v1520_v41, %v1520_v41 }
 0x11f   :  { %v648_v21 = vadd.f32 %v647_v39, %v1411_v55  ;;  %v780_v54 = vadd.f32 %v779_v43, %v717_v38  ;;  %v720_v55 = vmul.f32 %v1439_v7, %v1439_v7 }
 0x121   :  { %v649_v58 = vadd.f32 %v648_v21, %v1423_v63  ;;  %v781_v33 = vadd.f32 %v780_v54, %v718_v37 }
 0x123   :  { %v650_v59 = vadd.f32 %v649_v58, %v1439_v7  ;;  %v782_v40 = vadd.f32 %v781_v33, %v719_v49  ;;  %v1636_v7 = vpop.f32.mrf.mxu3 }
 0x125   :  { %v783_v62 = vadd.f32 %v782_v40, %v720_v55  ;;  %v651_v63 = vadd.f32 %v650_v59, %v1451_v12  ;;  %v730_v59 = vmul.f32 %v1582_v9, %v1582_v9 }
 0x127   :  { %v652_v8 = vadd.f32 %v651_v63, %v1460_v16  ;;  %v784_v14 = vadd.f32 %v783_v62, %v721_v61  ;;  %v725_v16 = vmul.f32 %v1504_v34, %v1504_v34  ;;  %v732_v63 = vmul.f32 %v1427_v2, %v1427_v2 }
 0x129   :  { %v653_v18 = vadd.f32 %v652_v8, %v1474_v22  ;;  %v785_v3 = vadd.f32 %v784_v14, %v722_v1  ;;  %v1650_v22 = vpop.f32.mrf.mxu2  ;;  %v733_v8 = vmul.f32 %v1443_v10, %v1443_v10 }
 0x12b   :  { %v654_v12 = vadd.f32 %v653_v18, %v1490_v28  ;;  %v786_v15 = vadd.f32 %v785_v3, %v723_v47  ;;  %v1652_v43 = vpop.f32.mrf.mxu3  ;;  %v1163_v28 = vpack.c.bf16 %v1650_v22, %v1634_v6  ;;  %v734_v47 = vmul.f32 %v1453_v13, %v1453_v13 }
 0x12c   :  { %v1193_v37 = vpack.c.bf16 %v1652_v43, %v1636_v7 }
 0x12d   :  { %v655_v26 = vadd.f32 %v654_v12, %v1504_v34  ;;  %v787_v29 = vadd.f32 %v786_v15, %v724_v11  ;;  %v727_v34 = vmul.f32 %v1534_v48, %v1534_v48  ;;  %1227 = vst [vmem:[%s1789_s2 + $0xb8] sm:$0xff] %v1163_v28  }
 0x12e   :  { %1233 = vst [vmem:[%s1789_s2 + $0xe8] sm:$0xff] %v1193_v37   ;;  %v739_v37 = vmul.f32 %v1524_v45, %v1524_v45 }
 0x12f   :  { %v656_v38 = vadd.f32 %v655_v26, %v1520_v41  ;;  %v788_v39 = vadd.f32 %v787_v29, %v725_v16  ;;  %v737_v26 = vmul.f32 %v1494_v31, %v1494_v31 }
 0x131   :  { %v657_v21 = vadd.f32 %v656_v38, %v1534_v48  ;;  %v789_v54 = vadd.f32 %v788_v39, %v726_v30  ;;  %v729_v48 = vmul.f32 %v1566_v44, %v1566_v44 }
 0x133   :  { %v790_v41 = vadd.f32 %v789_v54, %v727_v34  ;;  %v658_v42 = vadd.f32 %v657_v21, %v1552_v5  ;;  %v1676_v40 = vpop.f32.mrf.mxu3  ;;  %v731_v5 = vmul.f32 %v1415_v60, %v1415_v60  ;;  %v740_v34 = vmul.f32 %v1536_v50, %v1536_v50 }
 0x135   :  { %v791_v49 = vadd.f32 %v790_v41, %v728_v27  ;;  %v659_v58 = vadd.f32 %v658_v42, %v1566_v44  ;;  %v741_v41 = vmul.f32 %v1556_v17, %v1556_v17 }
 0x137   :  { %v792_v33 = vadd.f32 %v791_v49, %v729_v48  ;;  %v660_v55 = vadd.f32 %v659_v58, %v1582_v9  ;;  %v742_v49 = vmul.f32 %v1568_v52, %v1568_v52 }
 0x139   :  { %v661_v61 = vadd.f32 %v660_v55, %v1415_v60  ;;  %v793_v62 = vadd.f32 %v792_v33, %v730_v59 }
 0x13b   :  { %v662_v1 = vadd.f32 %v661_v61, %v1427_v2  ;;  %v794_v44 = vadd.f32 %v793_v62, %v731_v5  ;;  %v1690_v60 = vpop.f32.mrf.mxu3  ;;  %v735_v2 = vmul.f32 %v1464_v19, %v1464_v19  ;;  %v745_v62 = vmul.f32 %v1634_v6, %v1634_v6 }
 0x13c   :  { %v1198_v11 = vpack.c.bf16 %v1690_v60, %v1676_v40 }
 0x13d   :  { %v663_v14 = vadd.f32 %v662_v1, %v1443_v10  ;;  %v795_v9 = vadd.f32 %v794_v44, %v732_v63  ;;  %v736_v10 = vmul.f32 %v1476_v23, %v1476_v23  ;;  %v747_v44 = vmul.f32 %v1466_v20, %v1466_v20 }
 0x13e   :  { %1234 = vst [vmem:[%s1789_s2 + $0xf0] sm:$0xff] %v1198_v11  }
 0x13f   :  { %v664_v18 = vadd.f32 %v663_v14, %v1453_v13  ;;  %v796_v3 = vadd.f32 %v795_v9, %v733_v8 }
 0x141   :  { %v665_v12 = vadd.f32 %v664_v18, %v1464_v19  ;;  %v797_v15 = vadd.f32 %v796_v3, %v734_v47  ;;  %v738_v19 = vmul.f32 %v1506_v35, %v1506_v35 }
 0x143   :  { %v666_v13 = vadd.f32 %v665_v12, %v1476_v23  ;;  %v798_v16 = vadd.f32 %v797_v15, %v735_v2  ;;  %v1709_v28 = vpop.f32.mrf.mxu3 }
 0x145   :  { %v799_v29 = vadd.f32 %v798_v16, %v736_v10  ;;  %v667_v30 = vadd.f32 %v666_v13, %v1494_v31 }
 0x147   :  { %v668_v38 = vadd.f32 %v667_v30, %v1506_v35  ;;  %v800_v39 = vadd.f32 %v799_v29, %v737_v26 }
 0x149   :  { %v669_v23 = vadd.f32 %v668_v38, %v1524_v45  ;;  %v801_v21 = vadd.f32 %v800_v39, %v738_v19 }
 0x14b   :  { %v670_v54 = vadd.f32 %v669_v23, %v1536_v50  ;;  %v802_v31 = vadd.f32 %v801_v21, %v739_v37  ;;  %v499_v45 = vpop.f32.mrf.mxu3  ;;  %v743_v50 = vmul.f32 %v1586_v25, %v1586_v25 }
 0x14c   :  { %v1203_v48 = vpack.c.bf16 %v499_v45, %v1709_v28 }
 0x14d   :  { %v671_v35 = vadd.f32 %v670_v54, %v1556_v17  ;;  %v803_v42 = vadd.f32 %v802_v31, %v740_v34  ;;  %v758_v34 = vmul.f32 %v1652_v43, %v1652_v43 }
 0x14e   :  { %1235 = vst [vmem:[%s1789_s2 + $0xf8] sm:$0xff] %v1203_v48   ;;  %v762_v48 = vmul.f32 %v499_v45, %v499_v45 }
 0x14f   :  { %v672_v27 = vadd.f32 %v671_v35, %v1568_v52  ;;  %v804_v58 = vadd.f32 %v803_v42, %v741_v41  ;;  %v744_v52 = vmul.f32 %v1608_v56, %v1608_v56  ;;  %v759_v41 = vmul.f32 %v1676_v40, %v1676_v40 }
 0x150   :  { %v760_v42 = vmul.f32 %v1690_v60, %v1690_v60 }
 0x151   :  { %v805_v33 = vadd.f32 %v804_v58, %v742_v49  ;;  %v673_v55 = vadd.f32 %v672_v27, %v1586_v25  ;;  %v746_v25 = vmul.f32 %v1650_v22, %v1650_v22  ;;  %v761_v49 = vmul.f32 %v1709_v28, %v1709_v28 }
 0x153   :  { %v806_v17 = vadd.f32 %v805_v33, %v743_v50  ;;  %v674_v59 = vadd.f32 %v673_v55, %v1608_v56  ;;  %v748_v56 = vmul.f32 %v1478_v24, %v1478_v24 }
 0x155   :  { %v807_v5 = vadd.f32 %v806_v17, %v744_v52  ;;  %v675_v61 = vadd.f32 %v674_v59, %v1634_v6  ;;  %v749_v6 = vmul.f32 %v1496_v32, %v1496_v32 }
 0x157   :  { %v808_v63 = vadd.f32 %v807_v5, %v745_v62  ;;  %v676_v1 = vadd.f32 %v675_v61, %v1650_v22  ;;  %v750_v22 = vmul.f32 %v1508_v36, %v1508_v36 }
 0x159   :  { %v677_v8 = vadd.f32 %v676_v1, %v1466_v20  ;;  %v809_v14 = vadd.f32 %v808_v63, %v746_v25  ;;  %v751_v20 = vmul.f32 %v1526_v46, %v1526_v46 }
 0x15b   :  { %v678_v9 = vadd.f32 %v677_v8, %v1478_v24  ;;  %v810_v47 = vadd.f32 %v809_v14, %v747_v44  ;;  %v752_v24 = vmul.f32 %v1538_v51, %v1538_v51 }
 0x15d   :  { %v679_v18 = vadd.f32 %v678_v9, %v1496_v32  ;;  %v811_v3 = vadd.f32 %v810_v47, %v748_v56  ;;  %v753_v32 = vmul.f32 %v1558_v0, %v1558_v0 }
 0x15f   :  { %v680_v11 = vadd.f32 %v679_v18, %v1508_v36  ;;  %v812_v2 = vadd.f32 %v811_v3, %v749_v6  ;;  %v754_v36 = vmul.f32 %v1570_v53, %v1570_v53 }
 0x161   :  { %v681_v12 = vadd.f32 %v680_v11, %v1526_v46  ;;  %v813_v15 = vadd.f32 %v812_v2, %v750_v22  ;;  %v755_v46 = vmul.f32 %v1588_v4, %v1588_v4 }
 0x163   :  { %v682_v10 = vadd.f32 %v681_v12, %v1538_v51  ;;  %v814_v13 = vadd.f32 %v813_v15, %v751_v20  ;;  %v756_v51 = vmul.f32 %v1610_v57, %v1610_v57 }
 0x165   :  { %v815_v16 = vadd.f32 %v814_v13, %v752_v24  ;;  %v683_v26 = vadd.f32 %v682_v10, %v1558_v0  ;;  %v757_v0 = vmul.f32 %v1636_v7, %v1636_v7 }
 0x167   :  { %v684_v29 = vadd.f32 %v683_v26, %v1570_v53  ;;  %v816_v30 = vadd.f32 %v815_v16, %v753_v32 }
 0x169   :  { %v685_v19 = vadd.f32 %v684_v29, %v1588_v4  ;;  %v817_v38 = vadd.f32 %v816_v30, %v754_v36 }
 0x16b   :  { %v686_v39 = vadd.f32 %v685_v19, %v1610_v57  ;;  %v818_v37 = vadd.f32 %v817_v38, %v755_v46 }
 0x16d   :  { %v687_v23 = vadd.f32 %v686_v39, %v1636_v7  ;;  %v819_v21 = vadd.f32 %v818_v37, %v756_v51 }
 0x16f   :  { %v688_v53 = vadd.f32 %v687_v23, %v1652_v43  ;;  %v820_v54 = vadd.f32 %v819_v21, %v757_v0 }
 0x171   :  { %v821_v4 = vadd.f32 %v820_v54, %v758_v34  ;;  %v689_v31 = vadd.f32 %v688_v53, %v1676_v40 }
 0x173   :  { %v822_v57 = vadd.f32 %v821_v4, %v759_v41  ;;  %v690_v35 = vadd.f32 %v689_v31, %v1690_v60 }
 0x175   :  { %v823_v7 = vadd.f32 %v822_v57, %v760_v42  ;;  %v691_v27 = vadd.f32 %v690_v35, %v1709_v28 }
 0x177   :  { %v824_v43 = vadd.f32 %v823_v7, %v761_v49  ;;  %v692_v58 = vadd.f32 %v691_v27, %v499_v45 }
 0x179   :  { %v693_v33 = vrot.slane %v692_v58, 4  ;;  %v825_v55 = vadd.f32 %v824_v43, %v762_v48 }
 0x17b   :  { %v694_v50 = vadd.f32 %v693_v33, %v692_v58  ;;  %v826_v17 = vrot.slane %v825_v55, 4 }
 0x17d   :  { %v695_v40 = vrot.slane %v694_v50, 2  ;;  %v827_v59 = vadd.f32 %v826_v17, %v825_v55 }
 0x17f   :  { %v696_v52 = vadd.f32 %v695_v40, %v694_v50  ;;  %v828_v5 = vrot.slane %v827_v59, 2 }
 0x181   :  { %v697_v61 = vrot.slane %v696_v52, 1  ;;  %v829_v62 = vadd.f32 %v828_v5, %v827_v59 }
 0x183   :  { %v830_v60 = vrot.slane %v829_v62, 1  ;;  %v698_v63 = vadd.f32 %v697_v61, %v696_v52 }
 0x185   :  { %v831_v1 = vadd.f32 %v830_v60, %v829_v62 }
 0x187   :  { %v833_v25 = vsel %vm832_vm0, %v698_v63, %v831_v1 }
 0x188   :  { %v835_v28 = vsel %vm834_vm1, %v833_v25, 0.0 }
 0x189   :  { %836 = vst [vmem:[%s1790_s3] sm:$0xff] %v835_v28 }

</bundles_post_ra>
